<compile_context>
chip_gen: v5e
topology: v5e:2x2
jax: 0.10.0
libtpu: 0.0.40
codegen_flags: <defaults>
</compile_context>

<pallas_src>
import jax
import jax.numpy as jnp
from jax.experimental import pallas as pl
from jax.experimental.pallas import tpu as pltpu

INPUT_SIZE = 784
HIDDEN_SIZE = 500
HIDDEN_PAD = 512        # 500 -> 512: full, unmasked MXU tiles for both dots
NUM_CLASSES = 10
PADDED_CLASSES = 128    # lane-dense output width (unmasked full-width stores)
MAX_TILE_B = 512        # 256-multiple; ~85% of HBM roofline per measured data


def mlp_kernel(x_ref, w1_ref, b1_ref, w2_ref, b2_ref, o_ref):
    # Cast the f32 x tile to bf16 in-kernel (hides under the MXU pass, avoids a
    # separate HBM cast pass in the wrapper).  Both dots accumulate in f32.
    x = x_ref[...].astype(jnp.bfloat16)
    h = jnp.dot(x, w1_ref[...], preferred_element_type=jnp.float32)
    h = jnp.maximum(h + b1_ref[...], 0.0)                     # (TILE_B, 512)
    out = jnp.dot(h.astype(jnp.bfloat16), w2_ref[...],
                  preferred_element_type=jnp.float32)
    o_ref[...] = (out + b2_ref[...]).astype(o_ref.dtype)      # (TILE_B, 128)


def prepare_params(w1, b1, w2, b2):
    """One-time weight prep (hoisted out of the per-call forward).

    Weights are stored [in, out].  bf16 for the MXU; hidden dim zero-padded
    500 -> 512 and class dim zero-padded 10 -> 128.  Padding is exact zeros, so
    the extra hidden units are ReLU(0)=0 and contribute nothing to the output.
    """
    w1_p = jnp.pad(w1.astype(jnp.bfloat16),
                   ((0, 0), (0, HIDDEN_PAD - HIDDEN_SIZE)))
    b1_p = jnp.pad(b1, ((0, 0), (0, HIDDEN_PAD - HIDDEN_SIZE)))
    w2_p = jnp.pad(w2.astype(jnp.bfloat16),
                   ((0, HIDDEN_PAD - HIDDEN_SIZE),
                    (0, PADDED_CLASSES - NUM_CLASSES)))
    b2_p = jnp.pad(b2, ((0, 0), (0, PADDED_CLASSES - NUM_CLASSES)))
    return w1_p, b1_p, w2_p, b2_p


def _choose_tile_b(batch):
    """Batch-tile size: big tiles for bandwidth, >=2 grid steps for megacore."""
    if batch <= 256:
        # Single tile covering the (small) batch, rounded up to 8 sublanes.
        # The ragged tail (if any) is handled by the pipeline's masked writes.
        return max(8, ((batch + 7) // 8) * 8)
    # Large batch: 256-multiple tiles, capped so the grid has >= 2 steps so
    # dimension_semantics=("parallel",) can split work across v7x's two TCs.
    half = (batch + 1) // 2
    return min(MAX_TILE_B, ((half + 255) // 256) * 256)


def neural_net_forward(x, prepared_params):
    """x: (B, 784) f32; prepared_params from prepare_params(); -> (B, 10) f32."""
    w1_p, b1_p, w2_p, b2_p = prepared_params
    B = x.shape[0]
    tile_b = _choose_tile_b(B)
    num_tiles = pl.cdiv(B, tile_b)     # ragged last tile handled by Pallas

    out = pl.pallas_call(
        mlp_kernel,
        out_shape=jax.ShapeDtypeStruct((B, PADDED_CLASSES), jnp.float32),
        grid_spec=pltpu.PrefetchScalarGridSpec(
            num_scalar_prefetch=0,
            grid=(num_tiles,),
            in_specs=[
                # x: new batch tile each step (auto double-buffered DMA), f32.
                pl.BlockSpec((tile_b, INPUT_SIZE), lambda i: (i, 0)),
                # Weights / biases: constant index_map -> resident in VMEM.
                pl.BlockSpec((INPUT_SIZE, HIDDEN_PAD), lambda i: (0, 0)),
                pl.BlockSpec((1, HIDDEN_PAD), lambda i: (0, 0)),
                pl.BlockSpec((HIDDEN_PAD, PADDED_CLASSES), lambda i: (0, 0)),
                pl.BlockSpec((1, PADDED_CLASSES), lambda i: (0, 0)),
            ],
            out_specs=pl.BlockSpec((tile_b, PADDED_CLASSES), lambda i: (i, 0)),
        ),
        compiler_params=pltpu.CompilerParams(
            dimension_semantics=("parallel",),   # megacore sharding on v7x
            vmem_limit_bytes=32 << 20,           # footprint < 8 MiB, plenty
        ),
    )(x, w1_p, b1_p, w2_p, b2_p)

    # Drop the padded class lanes (batch is already exact -> no row slicing).
    return out[:, :NUM_CLASSES]


def init_params(key):
    """Deterministic init matching nn.Linear's U(-1/sqrt(fan_in), 1/sqrt(fan_in))."""
    k1, k2, k3, k4 = jax.random.split(key, 4)
    bound1 = 1.0 / (INPUT_SIZE ** 0.5)
    bound2 = 1.0 / (HIDDEN_SIZE ** 0.5)
    # Stored as [in, out] (transpose of PyTorch's [out, in]).
    w1 = jax.random.uniform(k1, (INPUT_SIZE, HIDDEN_SIZE), jnp.float32,
                            -bound1, bound1)
    b1 = jax.random.uniform(k2, (1, HIDDEN_SIZE), jnp.float32, -bound1, bound1)
    w2 = jax.random.uniform(k3, (HIDDEN_SIZE, NUM_CLASSES), jnp.float32,
                            -bound2, bound2)
    b2 = jax.random.uniform(k4, (1, NUM_CLASSES), jnp.float32, -bound2, bound2)
    return w1, b1, w2, b2


def _reference(x, w1, b1, w2, b2):
    return jnp.maximum(x @ w1 + b1, 0.0) @ w2 + b2


if __name__ == "__main__":
    key = jax.random.PRNGKey(0)
    k_x1, k_x2, k_p = jax.random.split(key, 3)

    w1, b1, w2, b2 = init_params(k_p)
    prepared = prepare_params(w1, b1, w2, b2)

    ok = True
    # Case 1: small exact batch (single tile).
    x_small = jax.random.normal(k_x1, (8, INPUT_SIZE), jnp.float32)
    out_small = jax.block_until_ready(neural_net_forward(x_small, prepared))
    ref_small = _reference(x_small, w1, b1, w2, b2)
    ok &= out_small.shape == (8, NUM_CLASSES)
    ok &= bool(jnp.allclose(out_small, ref_small, atol=3e-2, rtol=3e-2))

    # Case 2: ragged batch spanning two grid steps (exercises masked tail,
    # no host-side padding of x).
    x_rag = jax.random.normal(k_x2, (300, INPUT_SIZE), jnp.float32)
    out_rag = jax.block_until_ready(neural_net_forward(x_rag, prepared))
    ref_rag = _reference(x_rag, w1, b1, w2, b2)
    ok &= out_rag.shape == (300, NUM_CLASSES)
    ok &= bool(jnp.allclose(out_rag, ref_rag, atol=3e-2, rtol=3e-2))

    assert ok, (float(jnp.max(jnp.abs(out_small - ref_small))),
                float(jnp.max(jnp.abs(out_rag - ref_rag))))
    print("KERNEL_OK")
</pallas_src>

<mosaic_0001>
module attributes {stable_mosaic.version = 11 : i64} {
  func.func @mlp_kernel(%arg0: i32, %arg1: memref<8x784xf32, #tpu.memory_space<vmem>>, %arg2: memref<784x512xbf16, #tpu.memory_space<vmem>>, %arg3: memref<1x512xf32, #tpu.memory_space<vmem>>, %arg4: memref<512x128xbf16, #tpu.memory_space<vmem>>, %arg5: memref<1x128xf32, #tpu.memory_space<vmem>>, %arg6: memref<8x128xf32, #tpu.memory_space<vmem>>) attributes {dimension_semantics = [#tpu.dimension_semantics<parallel>], iteration_bounds = array<i64: 1>, scalar_prefetch = 0 : i64, scratch_operands = 0 : i64, tpu.core_type = #tpu.core_type<tc>, window_params = [{transform_indices = @transform_0, window_bounds = array<i64: 8, 784>}, {pipeline_mode = #tpu.pipeline_mode<synchronous>, transform_indices = @transform_1, window_bounds = array<i64: 784, 512>}, {pipeline_mode = #tpu.pipeline_mode<synchronous>, transform_indices = @transform_2, window_bounds = array<i64: 1, 512>}, {pipeline_mode = #tpu.pipeline_mode<synchronous>, transform_indices = @transform_3, window_bounds = array<i64: 512, 128>}, {pipeline_mode = #tpu.pipeline_mode<synchronous>, transform_indices = @transform_4, window_bounds = array<i64: 1, 128>}, {transform_indices = @transform_5, window_bounds = array<i64: 8, 128>}]} {
    %c0 = arith.constant 0 : index
    %c0_0 = arith.constant 0 : index
    %0 = vector.load %arg1[%c0, %c0_0] : memref<8x784xf32, #tpu.memory_space<vmem>>, vector<8x784xf32>
    %1 = arith.truncf %0 : vector<8x784xf32> to vector<8x784xbf16>
    %c0_1 = arith.constant 0 : index
    %c0_2 = arith.constant 0 : index
    %2 = vector.load %arg2[%c0_1, %c0_2] : memref<784x512xbf16, #tpu.memory_space<vmem>>, vector<784x512xbf16>
    %cst = arith.constant dense<0.000000e+00> : vector<8x512xf32>
    %3 = tpu.matmul %1, %2, %cst {dimension_numbers = #tpu.dot_dimension_numbers<[1], [0], [0], [1], [0, 0, 1, 1], [], []>} : vector<8x784xbf16>, vector<784x512xbf16>, vector<8x512xf32> -> vector<8x512xf32>
    %c0_3 = arith.constant 0 : index
    %c0_4 = arith.constant 0 : index
    %4 = vector.load %arg3[%c0_3, %c0_4] : memref<1x512xf32, #tpu.memory_space<vmem>>, vector<1x512xf32>
    %5 = vector.broadcast %4 : vector<1x512xf32> to vector<8x512xf32>
    %6 = arith.addf %3, %5 : vector<8x512xf32>
    %cst_5 = arith.constant 0.000000e+00 : f32
    %7 = vector.broadcast %cst_5 : f32 to vector<8x512xf32>
    %8 = arith.maximumf %6, %7 : vector<8x512xf32>
    %9 = arith.truncf %8 : vector<8x512xf32> to vector<8x512xbf16>
    %c0_6 = arith.constant 0 : index
    %c0_7 = arith.constant 0 : index
    %10 = vector.load %arg4[%c0_6, %c0_7] : memref<512x128xbf16, #tpu.memory_space<vmem>>, vector<512x128xbf16>
    %cst_8 = arith.constant dense<0.000000e+00> : vector<8x128xf32>
    %11 = tpu.matmul %9, %10, %cst_8 {dimension_numbers = #tpu.dot_dimension_numbers<[1], [0], [0], [1], [0, 0, 1, 1], [], []>} : vector<8x512xbf16>, vector<512x128xbf16>, vector<8x128xf32> -> vector<8x128xf32>
    %c0_9 = arith.constant 0 : index
    %c0_10 = arith.constant 0 : index
    %12 = vector.load %arg5[%c0_9, %c0_10] : memref<1x128xf32, #tpu.memory_space<vmem>>, vector<1x128xf32>
    %13 = vector.broadcast %12 : vector<1x128xf32> to vector<8x128xf32>
    %14 = arith.addf %11, %13 : vector<8x128xf32>
    %c0_11 = arith.constant 0 : index
    %c0_12 = arith.constant 0 : index
    %15 = vector.load %arg6[%c0_11, %c0_12] : memref<8x128xf32, #tpu.memory_space<vmem>>, vector<8x128xf32>
    tpu.vector_store %arg6[%c0_11, %c0_12], %14 {strides = array<i32>} : memref<8x128xf32, #tpu.memory_space<vmem>>, vector<8x128xf32>,
    return
  }
  func.func @transform_0(%arg0: i32) -> (i32, i32) {
    %c0_i32 = arith.constant 0 : i32
    %c0_i32_0 = arith.constant 0 : i32
    return %arg0, %c0_i32 : i32, i32
  }
  func.func @transform_1(%arg0: i32) -> (i32, i32) {
    %c0_i32 = arith.constant 0 : i32
    %c0_i32_0 = arith.constant 0 : i32
    %c0_i32_1 = arith.constant 0 : i32
    return %c0_i32, %c0_i32_0 : i32, i32
  }
  func.func @transform_2(%arg0: i32) -> (i32, i32) {
    %c0_i32 = arith.constant 0 : i32
    %c0_i32_0 = arith.constant 0 : i32
    %c0_i32_1 = arith.constant 0 : i32
    return %c0_i32, %c0_i32_0 : i32, i32
  }
  func.func @transform_3(%arg0: i32) -> (i32, i32) {
    %c0_i32 = arith.constant 0 : i32
    %c0_i32_0 = arith.constant 0 : i32
    %c0_i32_1 = arith.constant 0 : i32
    return %c0_i32, %c0_i32_0 : i32, i32
  }
  func.func @transform_4(%arg0: i32) -> (i32, i32) {
    %c0_i32 = arith.constant 0 : i32
    %c0_i32_0 = arith.constant 0 : i32
    %c0_i32_1 = arith.constant 0 : i32
    return %c0_i32, %c0_i32_0 : i32, i32
  }
  func.func @transform_5(%arg0: i32) -> (i32, i32) {
    %c0_i32 = arith.constant 0 : i32
    %c0_i32_0 = arith.constant 0 : i32
    return %arg0, %c0_i32 : i32, i32
  }
}

</mosaic_0001>

<bundles_post_ra>
// kernel: tpu_custom_call.1
= control target key start
LH: loop header
LB: loop body
LE: loop exit
PB: predicated region body
PF: predicated region fallthrough
CT: control target
= control target key end

     0   :  { %10 = vsyncpa [#allocation3], 0  ;;  %s3392_s0 = inlined_call_operand.hbm [shape: f32[8,784], index: 0, kind: input, shape index: {}]   ;;  %s3393_s1 = inlined_call_operand.hbm [shape: bf16[784,512], index: 1, kind: input, shape index: {}]   ;;  %s3394_s2 = inlined_call_operand.hbm [shape: f32[1,512], index: 2, kind: input, shape index: {}]   ;;  %s3395_s3 = inlined_call_operand.hbm [shape: bf16[512,128], index: 3, kind: input, shape index: {}]   ;;  %s3396_s4 = inlined_call_operand.vmem [shape: f32[1,128], index: 4, kind: input, shape index: {}]   ;;  %s3397_s5 = inlined_call_operand.hbm [shape: f32[8,128], index: 5, kind: output, shape index: {}]  }
   0x1   :  { %11 = vsyncpa [#allocation6], 0 }
   0x2   :  { %12 = vsyncpa [#allocation9], 0  ;;  %s29_s20 = sshll.u32 %s3393_s1, 4  ;;  %s30_s20 = int_to_ptr.hbm [resolvable:$true] %s29_s20 }
   0x3   :  { %13 = vsyncpa [#allocation4], 0  ;;  %s3271_s21 = smov [#allocation5]   ;;  %s19_s25 = sshll.u32 %s3392_s0, 4  ;;  %s20_s25 = int_to_ptr.hbm [resolvable:$true] %s19_s25 }
   0x4   :  { %s31_s22 = sshll.u32 %s3271_s21, 4  ;;  %s3272_s26 = smov 256   ;;  %s32_s22 = int_to_ptr.vmem [resolvable:$true] %s31_s22 }
   0x5   :  { %s3273_s27 = smov 16   ;;  %s3274_s28 = smov [#allocation2]  }
   0x6   :  { %37 = dma.hbm_to_vmem [thread:$0]  %s30_s20, 25088, %s32_s22, [#allocation6], %s3272_s26, %s3272_s26, %s3273_s27  }
   0x7   :  { %s21_s29 = sshll.u32 %s3274_s28, 4  ;;  %s43_s7 = sshll.u32 %s3394_s2, 4  ;;  %s22_s29 = int_to_ptr.vmem [resolvable:$true] %s21_s29  ;;  %s44_s7 = int_to_ptr.hbm [resolvable:$true] %s43_s7 }
   0x8   :  { %24 = dma.hbm_to_vmem [thread:$0]  %s20_s25, 896, %s22_s29, [#allocation3]  }
   0x9   :  { %s53_s9 = sshll.u32 %s3395_s3, 4  ;;  %s3275_s10 = smov [#allocation7]   ;;  %s54_s9 = int_to_ptr.hbm [resolvable:$true] %s53_s9 }
   0xa   :  { %s45_s11 = sshll.u32 %s3275_s10, 4  ;;  %s3276_s0 = smov [#allocation8]   ;;  %s46_s11 = int_to_ptr.vmem [resolvable:$true] %s45_s11 }
   0xb   :  { %48 = dma.hbm_to_vmem [thread:$0]  %s44_s7, 64, %s46_s11, [#allocation6]  }
   0xc   :  { %s55_s12 = sshll.u32 %s3276_s0, 4  ;;  %s3277_s13 = smov 64   ;;  %s56_s12 = int_to_ptr.vmem [resolvable:$true] %s55_s12 }
   0xd   :  { %s3278_s14 = smov 4  }
   0xe   :  { %61 = dma.hbm_to_vmem [thread:$0]  %s54_s9, 4096, %s56_s12, [#allocation9], %s3277_s13, %s3277_s13, %s3278_s14  }
   0xf   :  { %3263 = dma.done.wait [#allocation3], 896  }
  0x10   :  { %3264 = vsyncadd [#allocation3], 4294966400 }
  0x11   :  { %3265 = dma.done.wait [#allocation6], 25152  }
  0x12   :  { %3266 = vsyncadd [#allocation6], 4294942144 }
  0x13   :  { %3267 = dma.done.wait [#allocation9], 4096  }
  0x14   :  { %3268 = vsyncadd [#allocation9], 4294963200  ;;  %v2103_v0 = vld [vmem:[#allocation5 + $0xe0] sm:$0xf]  ;;  %v2935_v1 = vld [vmem:[#allocation5 + $0xec] sm:$0xf0] }
  0x15   :  { %v2231_v2 = vld [vmem:[#allocation5 + $0x1e0] sm:$0xf]  ;;  %v2104_v3 = vor.u32 %v2935_v1, %v2103_v0  ;;  %v2967_v4 = vld [vmem:[#allocation5 + $0x1ec] sm:$0xf0]  ;;  %vm1281_vm0 = vcmask 130048   ;;  %s3279_s15 = smov [#allocation10]  }
  0x16   :  { %v2359_v5 = vld [vmem:[#allocation5 + $0x2e0] sm:$0xf]  ;;  %v2999_v6 = vld [vmem:[#allocation5 + $0x2ec] sm:$0xf0]  ;;  %v2232_v7 = vor.u32 %v2967_v4, %v2231_v2  ;;  %s1975_s16 = sshll.u32 %s3279_s15, 4  ;;  %s1977_s19 = sshll.u32 %s3397_s5, 4  ;;  %s1976_s16 = int_to_ptr.vmem [resolvable:$true] %s1975_s16  ;;  %s1978_s19 = int_to_ptr.hbm [resolvable:$true] %s1977_s19 }
  0x17   :  { %v2360_v8 = vor.u32 %v2999_v6, %v2359_v5  ;;  %v2487_v9 = vld [vmem:[#allocation5 + $0x3e0] sm:$0xf]  ;;  %v3031_v10 = vld [vmem:[#allocation5 + $0x3ec] sm:$0xf0]  ;;  %1285 = vmatpush.bf16.msra.mxu0 %v2104_v3 }
  0x18   :  { %v2087_v11 = vld [vmem:[#allocation5 + $0xc0] sm:$0xf]  ;;  %v2488_v12 = vor.u32 %v3031_v10, %v2487_v9  ;;  %v2931_v13 = vld [vmem:[#allocation5 + $0xcc] sm:$0xf0]  ;;  %1298 = vmatpush.bf16.msra.mxu1 %v2232_v7 }
  0x19   :  { %v2215_v14 = vld [vmem:[#allocation5 + $0x1c0] sm:$0xf]  ;;  %v2963_v15 = vld [vmem:[#allocation5 + $0x1cc] sm:$0xf0]  ;;  %1311 = vmatpush.bf16.msra.mxu2 %v2360_v8  ;;  %v2088_v16 = vor.u32 %v2931_v13, %v2087_v11 }
  0x1a   :  { %v2216_v17 = vor.u32 %v2963_v15, %v2215_v14  ;;  %v2343_v18 = vld [vmem:[#allocation5 + $0x2c0] sm:$0xf]  ;;  %v2995_v19 = vld [vmem:[#allocation5 + $0x2cc] sm:$0xf0]  ;;  %1324 = vmatpush.bf16.msra.mxu3 %v2488_v12 }
  0x1b   :  { %v2471_v20 = vld [vmem:[#allocation5 + $0x3c0] sm:$0xf]  ;;  %v2344_v21 = vor.u32 %v2995_v19, %v2343_v18  ;;  %v3027_v22 = vld [vmem:[#allocation5 + $0x3cc] sm:$0xf0]  ;;  %1286 = vmatpush.bf16.msra.mxu0 %v2088_v16 }
  0x1c   :  { %v2071_v23 = vld [vmem:[#allocation5 + $0xa0] sm:$0xf]  ;;  %v2927_v24 = vld [vmem:[#allocation5 + $0xac] sm:$0xf0]  ;;  %v2472_v25 = vor.u32 %v3027_v22, %v2471_v20  ;;  %1299 = vmatpush.bf16.msra.mxu1 %v2216_v17 }
  0x1d   :  { %v2199_v26 = vld [vmem:[#allocation5 + $0x1a0] sm:$0xf]  ;;  %v2959_v27 = vld [vmem:[#allocation5 + $0x1ac] sm:$0xf0]  ;;  %v2072_v29 = vor.u32 %v2927_v24, %v2071_v23  ;;  %1312 = vmatpush.bf16.msra.mxu2 %v2344_v21 }
  0x1e   :  { %v2327_v28 = vld [vmem:[#allocation5 + $0x2a0] sm:$0xf]  ;;  %v2991_v30 = vld [vmem:[#allocation5 + $0x2ac] sm:$0xf0]  ;;  %v2200_v33 = vor.u32 %v2959_v27, %v2199_v26  ;;  %1325 = vmatpush.bf16.msra.mxu3 %v2472_v25 }
  0x1f   :  { %v2455_v31 = vld [vmem:[#allocation5 + $0x3a0] sm:$0xf]  ;;  %v3023_v32 = vld [vmem:[#allocation5 + $0x3ac] sm:$0xf0]  ;;  %v2328_v34 = vor.u32 %v2991_v30, %v2327_v28  ;;  %1287 = vmatpush.bf16.msra.mxu0 %v2072_v29 }
  0x20   :  { %v2055_v35 = vld [vmem:[#allocation5 + $0x80] sm:$0xf]  ;;  %v2923_v36 = vld [vmem:[#allocation5 + $0x8c] sm:$0xf0]  ;;  %v2456_v38 = vor.u32 %v3023_v32, %v2455_v31  ;;  %1300 = vmatpush.bf16.msra.mxu1 %v2200_v33  ;;  %v2933_v33 = vld [vmem:[#allocation5 + $0xe4] sm:$0xf] }
  0x21   :  { %v2183_v37 = vld [vmem:[#allocation5 + $0x180] sm:$0xf]  ;;  %v2955_v39 = vld [vmem:[#allocation5 + $0x18c] sm:$0xf0]  ;;  %v2056_v44 = vor.u32 %v2923_v36, %v2055_v35  ;;  %1313 = vmatpush.bf16.msra.mxu2 %v2328_v34  ;;  %v2105_v34 = vld [vmem:[#allocation5 + $0xf0] sm:$0xf0] }
  0x22   :  { %v2311_v40 = vld [vmem:[#allocation5 + $0x280] sm:$0xf]  ;;  %v2987_v41 = vld [vmem:[#allocation5 + $0x28c] sm:$0xf0]  ;;  %v2184_v45 = vor.u32 %v2955_v39, %v2183_v37  ;;  %1326 = vmatpush.bf16.msra.mxu3 %v2456_v38  ;;  %v83_v35 = vld [vmem:[#allocation2 + $0x10] sm:$0xff] }
  0x23   :  { %v2439_v42 = vld [vmem:[#allocation5 + $0x380] sm:$0xf]  ;;  %v3019_v43 = vld [vmem:[#allocation5 + $0x38c] sm:$0xf0]  ;;  %v2312_v46 = vor.u32 %v2987_v41, %v2311_v40  ;;  %1288 = vmatpush.bf16.msra.mxu0 %v2056_v44  ;;  %v81_v40 = vld [vmem:[#allocation2] sm:$0xff] }
  0x24   :  { %v2039_v47 = vld [vmem:[#allocation5 + $0x60] sm:$0xf]  ;;  %v2919_v48 = vld [vmem:[#allocation5 + $0x6c] sm:$0xf0]  ;;  %v2440_v50 = vor.u32 %v3019_v43, %v2439_v42  ;;  %1301 = vmatpush.bf16.msra.mxu1 %v2184_v45  ;;  %v2965_v43 = vld [vmem:[#allocation5 + $0x1e4] sm:$0xf] }
  0x25   :  { %v2167_v49 = vld [vmem:[#allocation5 + $0x160] sm:$0xf]  ;;  %v2951_v51 = vld [vmem:[#allocation5 + $0x16c] sm:$0xf0]  ;;  %v2040_v56 = vor.u32 %v2919_v48, %v2039_v47  ;;  %1314 = vmatpush.bf16.msra.mxu2 %v2312_v46  ;;  %v2233_v44 = vld [vmem:[#allocation5 + $0x1f0] sm:$0xf0]  ;;  %v2108_v47 = vor.u32 %v2933_v33, %v2105_v34 }
  0x26   :  { %v2295_v52 = vld [vmem:[#allocation5 + $0x260] sm:$0xf]  ;;  %v2983_v53 = vld [vmem:[#allocation5 + $0x26c] sm:$0xf0]  ;;  %v2168_v57 = vor.u32 %v2951_v51, %v2167_v49  ;;  %1327 = vmatpush.bf16.msra.mxu3 %v2440_v50  ;;  %v3322_v51 = vpack.c.bf16 %v83_v35, %v83_v35  ;;  %v2949_v35 = vld [vmem:[#allocation5 + $0x164] sm:$0xf] }
  0x27   :  { %v2423_v54 = vld [vmem:[#allocation5 + $0x360] sm:$0xf]  ;;  %v3015_v55 = vld [vmem:[#allocation5 + $0x36c] sm:$0xf0]  ;;  %v2296_v58 = vor.u32 %v2983_v53, %v2295_v52  ;;  %1289 = vmatpush.bf16.msra.mxu0 %v2040_v56  ;;  %v2929_v53 = vld [vmem:[#allocation5 + $0xc4] sm:$0xf] }
  0x28   :  { %v2023_v59 = vld [vmem:[#allocation5 + $0x40] sm:$0xf]  ;;  %v2915_v60 = vld [vmem:[#allocation5 + $0x4c] sm:$0xf0]  ;;  %v2424_v62 = vor.u32 %v3015_v55, %v2423_v54  ;;  %1302 = vmatpush.bf16.msra.mxu1 %v2168_v57  ;;  %v2089_v54 = vld [vmem:[#allocation5 + $0xd0] sm:$0xf0]  ;;  %v3324_v55 = vpack.c.bf16 %v81_v40, %v81_v40 }
  0x29   :  { %v2151_v61 = vld [vmem:[#allocation5 + $0x140] sm:$0xf]  ;;  %v2947_v63 = vld [vmem:[#allocation5 + $0x14c] sm:$0xf0]  ;;  %v2024_v4 = vor.u32 %v2915_v60, %v2023_v59  ;;  %1315 = vmatpush.bf16.msra.mxu2 %v2296_v58  ;;  %v2236_v59 = vor.u32 %v2965_v43, %v2233_v44  ;;  %v2913_v43 = vld [vmem:[#allocation5 + $0x44] sm:$0xf] }
  0x2a   :  { %v2279_v0 = vld [vmem:[#allocation5 + $0x240] sm:$0xf]  ;;  %v2979_v1 = vld [vmem:[#allocation5 + $0x24c] sm:$0xf0]  ;;  %v2152_v5 = vor.u32 %v2947_v63, %v2151_v61  ;;  %1328 = vmatpush.bf16.msra.mxu3 %v2424_v62  ;;  %v2961_v61 = vld [vmem:[#allocation5 + $0x1c4] sm:$0xf] }
  0x2b   :  { %v2407_v2 = vld [vmem:[#allocation5 + $0x340] sm:$0xf]  ;;  %v3011_v3 = vld [vmem:[#allocation5 + $0x34c] sm:$0xf0]  ;;  %v2280_v6 = vor.u32 %v2979_v1, %v2279_v0  ;;  %1290 = vmatpush.bf16.msra.mxu0 %v2024_v4  ;;  %v2217_v62 = vld [vmem:[#allocation5 + $0x1d0] sm:$0xf0]  ;;  %v2092_v0 = vor.u32 %v2929_v53, %v2089_v54 }
  0x2c   :  { %v2007_v7 = vld [vmem:[#allocation5 + $0x20] sm:$0xf]  ;;  %v2911_v8 = vld [vmem:[#allocation5 + $0x2c] sm:$0xf0]  ;;  %v2408_v10 = vor.u32 %v3011_v3, %v2407_v2  ;;  %1303 = vmatpush.bf16.msra.mxu1 %v2152_v5  ;;  %v2925_v5 = vld [vmem:[#allocation5 + $0xa4] sm:$0xf] }
  0x2d   :  { %v2135_v9 = vld [vmem:[#allocation5 + $0x120] sm:$0xf]  ;;  %v2943_v11 = vld [vmem:[#allocation5 + $0x12c] sm:$0xf0]  ;;  %v2008_v16 = vor.u32 %v2911_v8, %v2007_v7  ;;  %1316 = vmatpush.bf16.msra.mxu2 %v2280_v6  ;;  %v2073_v6 = vld [vmem:[#allocation5 + $0xb0] sm:$0xf0]  ;;  %v2220_v8 = vor.u32 %v2961_v61, %v2217_v62 }
  0x2e   :  { %v2263_v12 = vld [vmem:[#allocation5 + $0x220] sm:$0xf]  ;;  %v2975_v13 = vld [vmem:[#allocation5 + $0x22c] sm:$0xf0]  ;;  %v2136_v20 = vor.u32 %v2943_v11, %v2135_v9  ;;  %1329 = vmatpush.bf16.msra.mxu3 %v2408_v10  ;;  %v2957_v10 = vld [vmem:[#allocation5 + $0x1a4] sm:$0xf] }
  0x2f   :  { %v2391_v14 = vld [vmem:[#allocation5 + $0x320] sm:$0xf]  ;;  %v3007_v15 = vld [vmem:[#allocation5 + $0x32c] sm:$0xf0]  ;;  %v2264_v21 = vor.u32 %v2975_v13, %v2263_v12  ;;  %1291 = vmatpush.bf16.msra.mxu0 %v2008_v16  ;;  %v2201_v11 = vld [vmem:[#allocation5 + $0x1b0] sm:$0xf0]  ;;  %v2076_v13 = vor.u32 %v2925_v5, %v2073_v6 }
  0x30   :  { %v1991_v17 = vld [vmem:[#allocation5] sm:$0xf]  ;;  %v2907_v18 = vld [vmem:[#allocation5 + $0xc] sm:$0xf0]  ;;  %v2392_v25 = vor.u32 %v3007_v15, %v2391_v14  ;;  %1304 = vmatpush.bf16.msra.mxu1 %v2136_v20  ;;  %v2204_v20 = vor.u32 %v2957_v10, %v2201_v11  ;;  %v2025_v44 = vld [vmem:[#allocation5 + $0x50] sm:$0xf0] }
  0x31   :  { %v2119_v19 = vld [vmem:[#allocation5 + $0x100] sm:$0xf]  ;;  %v2939_v22 = vld [vmem:[#allocation5 + $0x10c] sm:$0xf0]  ;;  %v1992_v32 = vor.u32 %v2907_v18, %v1991_v17  ;;  %1317 = vmatpush.bf16.msra.mxu2 %v2264_v21  ;;  %v2921_v18 = vld [vmem:[#allocation5 + $0x84] sm:$0xf] }
  0x32   :  { %v2247_v23 = vld [vmem:[#allocation5 + $0x200] sm:$0xf]  ;;  %v2971_v24 = vld [vmem:[#allocation5 + $0x20c] sm:$0xf0]  ;;  %v2120_v36 = vor.u32 %v2939_v22, %v2119_v19  ;;  %1330 = vmatpush.bf16.msra.mxu3 %v2392_v25  ;;  %v2057_v19 = vld [vmem:[#allocation5 + $0x90] sm:$0xf0] }
  0x33   :  { %v2375_v26 = vld [vmem:[#allocation5 + $0x300] sm:$0xf]  ;;  %v3003_v27 = vld [vmem:[#allocation5 + $0x30c] sm:$0xf0]  ;;  %v2248_v37 = vor.u32 %v2971_v24, %v2247_v23  ;;  %1292 = vmatpush.bf16.msra.mxu0 %v1992_v32  ;;  %v2953_v22 = vld [vmem:[#allocation5 + $0x184] sm:$0xf]  ;;  %v2060_v25 = vor.u32 %v2921_v18, %v2057_v19 }
  0x34   :  { %v2615_v28 = vld [vmem:[#allocation5 + $0x4e0] sm:$0xf]  ;;  %v3063_v29 = vld [vmem:[#allocation5 + $0x4ec] sm:$0xf0]  ;;  %v2376_v41 = vor.u32 %v3003_v27, %v2375_v26  ;;  %1305 = vmatpush.bf16.msra.mxu1 %v2120_v36  ;;  %v2185_v23 = vld [vmem:[#allocation5 + $0x190] sm:$0xf0] }
  0x35   :  { %v2743_v30 = vld [vmem:[#allocation5 + $0x5e0] sm:$0xf]  ;;  %v3095_v31 = vld [vmem:[#allocation5 + $0x5ec] sm:$0xf0]  ;;  %v2616_v42 = vor.u32 %v3063_v29, %v2615_v28  ;;  %1318 = vmatpush.bf16.msra.mxu2 %v2248_v37  ;;  %v87_v32 = vld [vmem:[#allocation2 + $0x30] sm:$0xff]  ;;  %v2188_v33 = vor.u32 %v2953_v22, %v2185_v23 }
  0x36   :  { %v2759_v38 = vld [vmem:[#allocation5 + $0x600] sm:$0xf]  ;;  %v3099_v39 = vld [vmem:[#allocation5 + $0x60c] sm:$0xf0]  ;;  %v2744_v46 = vor.u32 %v3095_v31, %v2743_v30  ;;  %1331 = vmatpush.bf16.msra.mxu3 %v2376_v41  ;;  %1293 = vmatmul.bf16.vlgmr.msra.gmra.mxu0 %v3324_v55  ;;  %v2917_v30 = vld [vmem:[#allocation5 + $0x64] sm:$0xf] }
  0x37   :  { %v84_v45 = vld [vmem:[#allocation2 + $0x18] sm:$0xff]  ;;  %v3059_v49 = vld [vmem:[#allocation5 + $0x4cc] sm:$0xf0]  ;;  %v2760_v56 = vor.u32 %v3099_v39, %v2759_v38  ;;  %1337 = vmatpush.bf16.msrb.mxu0 %v2616_v42  ;;  %v2041_v31 = vld [vmem:[#allocation5 + $0x70] sm:$0xf0] }
  0x38   :  { %v2599_v48 = vld [vmem:[#allocation5 + $0x4c0] sm:$0xf]  ;;  %v3091_v52 = vld [vmem:[#allocation5 + $0x5cc] sm:$0xf0]  ;;  %v3326_v57 = vpack.c.bf16 %v84_v45, %v84_v45  ;;  %1350 = vmatpush.bf16.msrb.mxu1 %v2744_v46  ;;  %1319 = vmatmul.bf16.vlgmr.msra.gmra.mxu2 %v3322_v51  ;;  %v2169_v36 = vld [vmem:[#allocation5 + $0x170] sm:$0xf0]  ;;  %v2044_v38 = vor.u32 %v2917_v30, %v2041_v31  ;;  %v3334_v45 = vpack.c.bf16 %v87_v32, %v87_v32 }
  0x39   :  { %v2727_v50 = vld [vmem:[#allocation5 + $0x5c0] sm:$0xf]  ;;  %v82_v58 = vld [vmem:[#allocation2 + $0x8] sm:$0xff]  ;;  %v2600_v60 = vor.u32 %v3059_v49, %v2599_v48  ;;  %1370 = vmatpush.bf16.msrb.mxu2 %v2760_v56  ;;  %v2172_v46 = vor.u32 %v2949_v35, %v2169_v36  ;;  %v2945_v48 = vld [vmem:[#allocation5 + $0x144] sm:$0xf] }
  0x3a   :  { %1376 = vmatpush.bf16.msrb.mxu3 %v2108_v47  ;;  %v2728_v63 = vor.u32 %v3091_v52, %v2727_v50  ;;  %v2583_v1 = vld [vmem:[#allocation5 + $0x4a0] sm:$0xf]  ;;  %v3055_v2 = vld [vmem:[#allocation5 + $0x4ac] sm:$0xf0]  ;;  %v3330_v7 = vpack.c.bf16 %v82_v58, %v82_v58  ;;  %v2153_v49 = vld [vmem:[#allocation5 + $0x150] sm:$0xf0]  ;;  %v2028_v52 = vor.u32 %v2913_v43, %v2025_v44 }
  0x3b   :  { %v2711_v3 = vld [vmem:[#allocation5 + $0x5a0] sm:$0xf]  ;;  %v3087_v4 = vld [vmem:[#allocation5 + $0x5ac] sm:$0xf0]  ;;  %1332 = vmatmul.bf16.vlgmr.msra.gmra.mxu3 %v3326_v57  ;;  %1338 = vmatpush.bf16.msrb.mxu0 %v2600_v60  ;;  %v2584_v9 = vor.u32 %v3055_v2, %v2583_v1  ;;  %v2009_v60 = vld [vmem:[#allocation5 + $0x30] sm:$0xf0]  ;;  %v2156_v61 = vor.u32 %v2945_v48, %v2153_v49 }
  0x3c   :  { %1351 = vmatpush.bf16.msrb.mxu1 %v2728_v63  ;;  %v2712_v12 = vor.u32 %v3087_v4, %v2711_v3  ;;  %v2567_v14 = vld [vmem:[#allocation5 + $0x480] sm:$0xf]  ;;  %v3051_v15 = vld [vmem:[#allocation5 + $0x48c] sm:$0xf0]  ;;  %v2941_v63 = vld [vmem:[#allocation5 + $0x124] sm:$0xf] }
  0x3d   :  { %1389 = vmatpush.bf16.msra.mxu2 %v2236_v59  ;;  %v2695_v16 = vld [vmem:[#allocation5 + $0x580] sm:$0xf]  ;;  %1306 = vmatmul.bf16.vlgmr.msra.gmra.mxu1 %v3330_v7  ;;  %v3083_v17 = vld [vmem:[#allocation5 + $0x58c] sm:$0xf0]  ;;  %v2568_v21 = vor.u32 %v3051_v15, %v2567_v14  ;;  %v2909_v59 = vld [vmem:[#allocation5 + $0x24] sm:$0xf] }
  0x3e   :  { %1377 = vmatpush.bf16.msrb.mxu3 %v2092_v0  ;;  %v2696_v24 = vor.u32 %v3083_v17, %v2695_v16  ;;  %v2551_v26 = vld [vmem:[#allocation5 + $0x460] sm:$0xf]  ;;  %v3047_v27 = vld [vmem:[#allocation5 + $0x46c] sm:$0xf0]  ;;  %v2137_v0 = vld [vmem:[#allocation5 + $0x130] sm:$0xf0]  ;;  %v2012_v3 = vor.u32 %v2909_v59, %v2009_v60 }
  0x3f   :  { %1339 = vmatpush.bf16.msrb.mxu0 %v2584_v9  ;;  %v2679_v28 = vld [vmem:[#allocation5 + $0x560] sm:$0xf]  ;;  %v3079_v29 = vld [vmem:[#allocation5 + $0x56c] sm:$0xf0]  ;;  %v2552_v34 = vor.u32 %v3047_v27, %v2551_v26  ;;  %v1993_v9 = vld [vmem:[#allocation5 + $0x10] sm:$0xf0]  ;;  %v2140_v14 = vor.u32 %v2941_v63, %v2137_v0 }
  0x40   :  { %1352 = vmatpush.bf16.msrb.mxu1 %v2712_v12  ;;  %v2680_v37 = vor.u32 %v3079_v29, %v2679_v28  ;;  %v2535_v39 = vld [vmem:[#allocation5 + $0x440] sm:$0xf]  ;;  %v3043_v40 = vld [vmem:[#allocation5 + $0x44c] sm:$0xf0]  ;;  %v2997_v10 = vld [vmem:[#allocation5 + $0x2e4] sm:$0xf] }
  0x41   :  { %1390 = vmatpush.bf16.msra.mxu2 %v2220_v8  ;;  %v2663_v41 = vld [vmem:[#allocation5 + $0x540] sm:$0xf]  ;;  %v3075_v42 = vld [vmem:[#allocation5 + $0x54c] sm:$0xf0]  ;;  %v2536_v47 = vor.u32 %v3043_v40, %v2535_v39  ;;  %v2905_v8 = vld [vmem:[#allocation5 + $0x4] sm:$0xf] }
  0x42   :  { %1378 = vmatpush.bf16.msrb.mxu3 %v2076_v13  ;;  %v2664_v50 = vor.u32 %v3075_v42, %v2663_v41  ;;  %v2519_v53 = vld [vmem:[#allocation5 + $0x420] sm:$0xf]  ;;  %v3039_v54 = vld [vmem:[#allocation5 + $0x42c] sm:$0xf0]  ;;  %v2361_v11 = vld [vmem:[#allocation5 + $0x2f0] sm:$0xf0] }
  0x43   :  { %1340 = vmatpush.bf16.msrb.mxu0 %v2568_v21  ;;  %v2647_v56 = vld [vmem:[#allocation5 + $0x520] sm:$0xf]  ;;  %v3071_v58 = vld [vmem:[#allocation5 + $0x52c] sm:$0xf0]  ;;  %v2520_v62 = vor.u32 %v3039_v54, %v2519_v53  ;;  %v3029_v12 = vld [vmem:[#allocation5 + $0x3e4] sm:$0xf] }
  0x44   :  { %1353 = vmatpush.bf16.msrb.mxu1 %v2696_v24  ;;  %v2503_v1 = vld [vmem:[#allocation5 + $0x400] sm:$0xf]  ;;  %v2648_v2 = vor.u32 %v3071_v58, %v2647_v56  ;;  %v3035_v4 = vld [vmem:[#allocation5 + $0x40c] sm:$0xf0]  ;;  %v2489_v13 = vld [vmem:[#allocation5 + $0x3f0] sm:$0xf0]  ;;  %v2364_v24 = vor.u32 %v2997_v10, %v2361_v11 }
  0x45   :  { %1391 = vmatpush.bf16.msra.mxu2 %v2204_v20  ;;  %v2631_v5 = vld [vmem:[#allocation5 + $0x500] sm:$0xf]  ;;  %v3067_v6 = vld [vmem:[#allocation5 + $0x50c] sm:$0xf0]  ;;  %v2504_v15 = vor.u32 %v3035_v4, %v2503_v1  ;;  %v3061_v16 = vld [vmem:[#allocation5 + $0x4e4] sm:$0xf]  ;;  %v1996_v20 = vor.u32 %v2905_v8, %v1993_v9 }
  0x46   :  { %1379 = vmatpush.bf16.msrb.mxu3 %v2060_v25  ;;  %v2617_v17 = vld [vmem:[#allocation5 + $0x4f0] sm:$0xf0]  ;;  %v85_v18 = vld [vmem:[#allocation2 + $0x20] sm:$0xff]  ;;  %v2632_v19 = vor.u32 %v3067_v6, %v2631_v5  ;;  %v2937_v21 = vld [vmem:[#allocation5 + $0x104] sm:$0xf]  ;;  %v2492_v25 = vor.u32 %v3029_v12, %v2489_v13 }
  0x47   :  { %1341 = vmatpush.bf16.msrb.mxu0 %v2552_v34  ;;  %v2121_v22 = vld [vmem:[#allocation5 + $0x110] sm:$0xf0]  ;;  %v3093_v26 = vld [vmem:[#allocation5 + $0x5e4] sm:$0xf]  ;;  %v2620_v29 = vor.u32 %v3061_v16, %v2617_v17  ;;  %v3338_v30 = vpack.c.bf16 %v85_v18, %v85_v18 }
  0x48   :  { %1354 = vmatpush.bf16.msrb.mxu1 %v2680_v37  ;;  %2773 = vmatmul.msk.bf16.vlgmr.msrb.gmra.mxu2 %vm1281_vm0, %v3334_v45  ;;  %v86_v23 = vld [vmem:[#allocation2 + $0x28] sm:$0xff]  ;;  %v2993_v28 = vld [vmem:[#allocation5 + $0x2c4] sm:$0xf]  ;;  %v2124_v34 = vor.u32 %v2937_v21, %v2121_v22 }
  0x49   :  { %1392 = vmatpush.bf16.msra.mxu2 %v2188_v33  ;;  %v2745_v27 = vld [vmem:[#allocation5 + $0x5f0] sm:$0xf0]  ;;  %v3025_v32 = vld [vmem:[#allocation5 + $0x3c4] sm:$0xf]  ;;  %v3340_v35 = vpack.c.bf16 %v86_v23, %v86_v23 }
  0x4a   :  { %1380 = vmatpush.bf16.msrb.mxu3 %v2044_v38  ;;  %v2345_v31 = vld [vmem:[#allocation5 + $0x2d0] sm:$0xf0]  ;;  %v3057_v36 = vld [vmem:[#allocation5 + $0x4c4] sm:$0xf]  ;;  %v2748_v38 = vor.u32 %v3093_v26, %v2745_v27 }
  0x4b   :  { %1342 = vmatpush.bf16.msrb.mxu0 %v2536_v47  ;;  %v2473_v33 = vld [vmem:[#allocation5 + $0x3d0] sm:$0xf0]  ;;  %v2348_v39 = vor.u32 %v2993_v28, %v2345_v31  ;;  %v3089_v41 = vld [vmem:[#allocation5 + $0x5c4] sm:$0xf] }
  0x4c   :  { %1355 = vmatpush.bf16.msrb.mxu1 %v2664_v50  ;;  %v2601_v37 = vld [vmem:[#allocation5 + $0x4d0] sm:$0xf0]  ;;  %v2476_v40 = vor.u32 %v3025_v32, %v2473_v33  ;;  %v2989_v43 = vld [vmem:[#allocation5 + $0x2a4] sm:$0xf] }
  0x4d   :  { %1393 = vmatpush.bf16.msra.mxu2 %v2172_v46  ;;  %v2729_v42 = vld [vmem:[#allocation5 + $0x5d0] sm:$0xf0]  ;;  %v2604_v44 = vor.u32 %v3057_v36, %v2601_v37  ;;  %v3021_v47 = vld [vmem:[#allocation5 + $0x3a4] sm:$0xf] }
  0x4e   :  { %1381 = vmatpush.bf16.msrb.mxu3 %v2028_v52  ;;  %v2329_v46 = vld [vmem:[#allocation5 + $0x2b0] sm:$0xf0]  ;;  %v3053_v49 = vld [vmem:[#allocation5 + $0x4a4] sm:$0xf]  ;;  %v2732_v52 = vor.u32 %v3089_v41, %v2729_v42 }
  0x4f   :  { %1343 = vmatpush.bf16.msrb.mxu0 %v2520_v62  ;;  %v2457_v48 = vld [vmem:[#allocation5 + $0x3b0] sm:$0xf0]  ;;  %v2332_v53 = vor.u32 %v2989_v43, %v2329_v46  ;;  %v3085_v56 = vld [vmem:[#allocation5 + $0x5a4] sm:$0xf] }
  0x50   :  { %1356 = vmatpush.bf16.msrb.mxu1 %v2648_v2  ;;  %v2585_v50 = vld [vmem:[#allocation5 + $0x4b0] sm:$0xf0]  ;;  %v2460_v54 = vor.u32 %v3021_v47, %v2457_v48  ;;  %v2985_v59 = vld [vmem:[#allocation5 + $0x284] sm:$0xf] }
  0x51   :  { %1394 = vmatpush.bf16.msra.mxu2 %v2156_v61  ;;  %v2713_v58 = vld [vmem:[#allocation5 + $0x5b0] sm:$0xf0]  ;;  %v2588_v60 = vor.u32 %v3053_v49, %v2585_v50  ;;  %v3017_v62 = vld [vmem:[#allocation5 + $0x384] sm:$0xf] }
  0x52   :  { %1382 = vmatpush.bf16.msrb.mxu3 %v2012_v3  ;;  %v2313_v61 = vld [vmem:[#allocation5 + $0x290] sm:$0xf0]  ;;  %v3049_v0 = vld [vmem:[#allocation5 + $0x484] sm:$0xf]  ;;  %v2716_v2 = vor.u32 %v3085_v56, %v2713_v58  ;;  %v2111_v56 = vld [vmem:[#allocation5 + $0xe8] sm:$0xf] }
  0x53   :  { %1344 = vmatpush.bf16.msrb.mxu0 %v2504_v15  ;;  %v2441_v63 = vld [vmem:[#allocation5 + $0x390] sm:$0xf0]  ;;  %v2316_v3 = vor.u32 %v2985_v59, %v2313_v61  ;;  %v3081_v5 = vld [vmem:[#allocation5 + $0x584] sm:$0xf]  ;;  %v2936_v58 = vld [vmem:[#allocation5 + $0xf4] sm:$0xf0] }
  0x54   :  { %1357 = vmatpush.bf16.msrb.mxu1 %v2632_v19  ;;  %v2569_v1 = vld [vmem:[#allocation5 + $0x490] sm:$0xf0]  ;;  %v2444_v4 = vor.u32 %v3017_v62, %v2441_v63  ;;  %v2981_v8 = vld [vmem:[#allocation5 + $0x264] sm:$0xf]  ;;  %v2367_v62 = vld [vmem:[#allocation5 + $0x2e8] sm:$0xf] }
  0x55   :  { %1395 = vmatpush.bf16.msra.mxu2 %v2140_v14  ;;  %v2697_v6 = vld [vmem:[#allocation5 + $0x590] sm:$0xf0]  ;;  %v2572_v9 = vor.u32 %v3049_v0, %v2569_v1  ;;  %v3013_v11 = vld [vmem:[#allocation5 + $0x364] sm:$0xf]  ;;  %v3000_v63 = vld [vmem:[#allocation5 + $0x2f4] sm:$0xf0] }
  0x56   :  { %1383 = vmatpush.bf16.msrb.mxu3 %v1996_v20  ;;  %1345 = vmatmul.bf16.vlgmr.msrb.gmra.mxu0 %v3338_v30  ;;  %v2297_v10 = vld [vmem:[#allocation5 + $0x270] sm:$0xf0]  ;;  %v3045_v13 = vld [vmem:[#allocation5 + $0x464] sm:$0xf]  ;;  %v2700_v15 = vor.u32 %v3081_v5, %v2697_v6  ;;  %v2112_v5 = vor.u32 %v2936_v58, %v2111_v56  ;;  %v2495_v6 = vld [vmem:[#allocation5 + $0x3e8] sm:$0xf] }
  0x57   :  { %1402 = vmatpush.bf16.msra.mxu0 %v2364_v24  ;;  %1358 = vmatmul.bf16.vlgmr.msrb.gmra.mxu1 %v3340_v35  ;;  %v2425_v12 = vld [vmem:[#allocation5 + $0x370] sm:$0xf0]  ;;  %v2300_v16 = vor.u32 %v2981_v8, %v2297_v10  ;;  %v3077_v18 = vld [vmem:[#allocation5 + $0x564] sm:$0xf]  ;;  %v3032_v8 = vld [vmem:[#allocation5 + $0x3f4] sm:$0xf0] }
  0x58   :  { %1415 = vmatpush.bf16.msra.mxu1 %v2492_v25  ;;  %v2553_v14 = vld [vmem:[#allocation5 + $0x470] sm:$0xf0]  ;;  %v2428_v17 = vor.u32 %v3013_v11, %v2425_v12  ;;  %v2977_v20 = vld [vmem:[#allocation5 + $0x244] sm:$0xf]  ;;  %v2239_v10 = vld [vmem:[#allocation5 + $0x1e8] sm:$0xf]  ;;  %v2368_v12 = vor.u32 %v3000_v63, %v2367_v62 }
  0x59   :  { %1396 = vmatpush.bf16.msra.mxu2 %v2124_v34  ;;  %1384 = vmatmul.bf16.vlgmr.msrb.gmra.mxu3 %v3324_v55  ;;  %v2681_v19 = vld [vmem:[#allocation5 + $0x570] sm:$0xf0]  ;;  %v2556_v21 = vor.u32 %v3045_v13, %v2553_v14  ;;  %v3009_v23 = vld [vmem:[#allocation5 + $0x344] sm:$0xf]  ;;  %v2968_v11 = vld [vmem:[#allocation5 + $0x1f4] sm:$0xf0] }
  0x5a   :  { %1428 = vmatpush.bf16.msra.mxu3 %v2620_v29  ;;  %v2281_v22 = vld [vmem:[#allocation5 + $0x250] sm:$0xf0]  ;;  %v3041_v25 = vld [vmem:[#allocation5 + $0x444] sm:$0xf]  ;;  %v2684_v27 = vor.u32 %v3077_v18, %v2681_v19  ;;  %v2095_v14 = vld [vmem:[#allocation5 + $0xc8] sm:$0xf]  ;;  %v2240_v19 = vor.u32 %v2968_v11, %v2239_v10 }
  0x5b   :  { %1403 = vmatpush.bf16.msra.mxu0 %v2348_v39  ;;  %v2409_v24 = vld [vmem:[#allocation5 + $0x350] sm:$0xf0]  ;;  %v2284_v28 = vor.u32 %v2977_v20, %v2281_v22  ;;  %v3073_v31 = vld [vmem:[#allocation5 + $0x544] sm:$0xf]  ;;  %v2996_v18 = vld [vmem:[#allocation5 + $0x2d4] sm:$0xf0] }
  0x5c   :  { %1416 = vmatpush.bf16.msra.mxu1 %v2476_v40  ;;  %1397 = vmatmul.bf16.vlgmr.msra.gmra.mxu2 %v3330_v7  ;;  %v2537_v26 = vld [vmem:[#allocation5 + $0x450] sm:$0xf0]  ;;  %v2412_v29 = vor.u32 %v3009_v23, %v2409_v24  ;;  %v2973_v33 = vld [vmem:[#allocation5 + $0x224] sm:$0xf]  ;;  %v2479_v20 = vld [vmem:[#allocation5 + $0x3c8] sm:$0xf] }
  0x5d   :  { %1441 = vmatpush.bf16.msrb.mxu2 %v2748_v38  ;;  %v2665_v32 = vld [vmem:[#allocation5 + $0x550] sm:$0xf0]  ;;  %v2540_v34 = vor.u32 %v3041_v25, %v2537_v26  ;;  %v3005_v37 = vld [vmem:[#allocation5 + $0x324] sm:$0xf]  ;;  %v2223_v23 = vld [vmem:[#allocation5 + $0x1c8] sm:$0xf] }
  0x5e   :  { %1429 = vmatpush.bf16.msra.mxu3 %v2604_v44  ;;  %v2265_v36 = vld [vmem:[#allocation5 + $0x230] sm:$0xf0]  ;;  %v3037_v39 = vld [vmem:[#allocation5 + $0x424] sm:$0xf]  ;;  %v2668_v41 = vor.u32 %v3073_v31, %v2665_v32  ;;  %v2964_v24 = vld [vmem:[#allocation5 + $0x1d4] sm:$0xf0] }
  0x5f   :  { %1404 = vmatpush.bf16.msra.mxu0 %v2332_v53  ;;  %v2393_v38 = vld [vmem:[#allocation5 + $0x330] sm:$0xf0]  ;;  %v3069_v42 = vld [vmem:[#allocation5 + $0x524] sm:$0xf]  ;;  %v2268_v46 = vor.u32 %v2973_v33, %v2265_v36  ;;  %v2079_v26 = vld [vmem:[#allocation5 + $0xa8] sm:$0xf]  ;;  %v2224_v32 = vor.u32 %v2964_v24, %v2223_v23 }
  0x60   :  { %1417 = vmatpush.bf16.msra.mxu1 %v2460_v54  ;;  %v2521_v40 = vld [vmem:[#allocation5 + $0x430] sm:$0xf0]  ;;  %v2969_v44 = vld [vmem:[#allocation5 + $0x204] sm:$0xf]  ;;  %v2396_v47 = vor.u32 %v3005_v37, %v2393_v38  ;;  %v2992_v31 = vld [vmem:[#allocation5 + $0x2b4] sm:$0xf0] }
  0x61   :  { %1442 = vmatpush.bf16.msrb.mxu2 %v2732_v52  ;;  %v2649_v43 = vld [vmem:[#allocation5 + $0x530] sm:$0xf0]  ;;  %v3001_v49 = vld [vmem:[#allocation5 + $0x304] sm:$0xf]  ;;  %v2524_v52 = vor.u32 %v3037_v39, %v2521_v40  ;;  %v2463_v33 = vld [vmem:[#allocation5 + $0x3a8] sm:$0xf] }
  0x62   :  { %1430 = vmatpush.bf16.msra.mxu3 %v2588_v60  ;;  %v2249_v48 = vld [vmem:[#allocation5 + $0x210] sm:$0xf0]  ;;  %v3033_v53 = vld [vmem:[#allocation5 + $0x404] sm:$0xf]  ;;  %v2652_v60 = vor.u32 %v3069_v42, %v2649_v43  ;;  %v2207_v37 = vld [vmem:[#allocation5 + $0x1a8] sm:$0xf] }
  0x63   :  { %1405 = vmatpush.bf16.msra.mxu0 %v2316_v3  ;;  %v2377_v50 = vld [vmem:[#allocation5 + $0x310] sm:$0xf0]  ;;  %v3097_v59 = vld [vmem:[#allocation5 + $0x604] sm:$0xf]  ;;  %v2252_v0 = vor.u32 %v2969_v44, %v2249_v48  ;;  %v2960_v38 = vld [vmem:[#allocation5 + $0x1b4] sm:$0xf0] }
  0x64   :  { %1418 = vmatpush.bf16.msra.mxu1 %v2444_v4  ;;  %v2505_v54 = vld [vmem:[#allocation5 + $0x410] sm:$0xf0]  ;;  %v2380_v1 = vor.u32 %v3001_v49, %v2377_v50  ;;  %v2063_v40 = vld [vmem:[#allocation5 + $0x88] sm:$0xf]  ;;  %v2988_v44 = vld [vmem:[#allocation5 + $0x294] sm:$0xf0] }
  0x65   :  { %1443 = vmatpush.bf16.msrb.mxu2 %v2716_v2  ;;  %v2761_v61 = vld [vmem:[#allocation5 + $0x610] sm:$0xf0]  ;;  %v3065_v2 = vld [vmem:[#allocation5 + $0x504] sm:$0xf]  ;;  %v2508_v4 = vor.u32 %v3033_v53, %v2505_v54  ;;  %v2319_v43 = vld [vmem:[#allocation5 + $0x288] sm:$0xf] }
  0x66   :  { %1431 = vmatpush.bf16.msra.mxu3 %v2572_v9  ;;  %v2633_v3 = vld [vmem:[#allocation5 + $0x510] sm:$0xf0]  ;;  %v2764_v9 = vor.u32 %v3097_v59, %v2761_v61  ;;  %v3020_v48 = vld [vmem:[#allocation5 + $0x394] sm:$0xf0]  ;;  %v2191_v50 = vld [vmem:[#allocation5 + $0x188] sm:$0xf]  ;;  %v2320_v53 = vor.u32 %v2988_v44, %v2319_v43 }
  0x67   :  { %1406 = vmatpush.bf16.msra.mxu0 %v2300_v16  ;;  %v2636_v13 = vor.u32 %v3065_v2, %v2633_v3  ;;  %v2496_v16 = vor.u32 %v3032_v8, %v2495_v6  ;;  %v2047_v54 = vld [vmem:[#allocation5 + $0x68] sm:$0xf]  ;;  %v2920_v56 = vld [vmem:[#allocation5 + $0x74] sm:$0xf0] }
  0x68   :  { %1419 = vmatpush.bf16.msra.mxu1 %v2428_v17  ;;  %v2351_v17 = vld [vmem:[#allocation5 + $0x2c8] sm:$0xf]  ;;  %v3016_v63 = vld [vmem:[#allocation5 + $0x374] sm:$0xf0] }
  0x69   :  { %1444 = vmatpush.bf16.msrb.mxu2 %v2700_v15  ;;  %v2932_v15 = vld [vmem:[#allocation5 + $0xd4] sm:$0xf0]  ;;  %v2352_v25 = vor.u32 %v2996_v18, %v2351_v17  ;;  %v2303_v59 = vld [vmem:[#allocation5 + $0x268] sm:$0xf] }
  0x6a   :  { %1432 = vmatpush.bf16.msra.mxu3 %v2556_v21  ;;  %v3028_v21 = vld [vmem:[#allocation5 + $0x3d4] sm:$0xf0]  ;;  %v2096_v22 = vor.u32 %v2932_v15, %v2095_v14  ;;  %v2431_v62 = vld [vmem:[#allocation5 + $0x368] sm:$0xf] }
  0x6b   :  { %1407 = vmatpush.bf16.msra.mxu0 %v2284_v28  ;;  %v2480_v28 = vor.u32 %v3028_v21, %v2479_v20  ;;  %v2952_v2 = vld [vmem:[#allocation5 + $0x174] sm:$0xf0]  ;;  %v2432_v6 = vor.u32 %v3016_v63, %v2431_v62  ;;  %v2287_v8 = vld [vmem:[#allocation5 + $0x248] sm:$0xf] }
  0x6c   :  { %1420 = vmatpush.bf16.msra.mxu1 %v2412_v29  ;;  %v2335_v29 = vld [vmem:[#allocation5 + $0x2a8] sm:$0xf]  ;;  %v2948_v15 = vld [vmem:[#allocation5 + $0x154] sm:$0xf0] }
  0x6d   :  { %1445 = vmatpush.bf16.msrb.mxu2 %v2684_v27  ;;  %v2928_v27 = vld [vmem:[#allocation5 + $0xb4] sm:$0xf0]  ;;  %v2336_v39 = vor.u32 %v2992_v31, %v2335_v29  ;;  %v2415_v11 = vld [vmem:[#allocation5 + $0x348] sm:$0xf] }
  0x6e   :  { %1433 = vmatpush.bf16.msra.mxu3 %v2540_v34  ;;  %v3024_v34 = vld [vmem:[#allocation5 + $0x3b4] sm:$0xf0]  ;;  %v2080_v36 = vor.u32 %v2928_v27, %v2079_v26  ;;  %v2159_v14 = vld [vmem:[#allocation5 + $0x148] sm:$0xf] }
  0x6f   :  { %1408 = vmatpush.bf16.msra.mxu0 %v2268_v46  ;;  %v2464_v42 = vor.u32 %v3024_v34, %v2463_v33  ;;  %v2208_v46 = vor.u32 %v2960_v38, %v2207_v37  ;;  %v2015_v17 = vld [vmem:[#allocation5 + $0x28] sm:$0xf]  ;;  %v2912_v18 = vld [vmem:[#allocation5 + $0x34] sm:$0xf0] }
  0x70   :  { %1421 = vmatpush.bf16.msra.mxu1 %v2396_v47  ;;  %v2447_v47 = vld [vmem:[#allocation5 + $0x388] sm:$0xf]  ;;  %v2976_v21 = vld [vmem:[#allocation5 + $0x234] sm:$0xf0] }
  0x71   :  { %1446 = vmatpush.bf16.msrb.mxu2 %v2668_v41  ;;  %v2924_v41 = vld [vmem:[#allocation5 + $0x94] sm:$0xf0]  ;;  %v2448_v58 = vor.u32 %v3020_v48, %v2447_v47  ;;  %v2271_v20 = vld [vmem:[#allocation5 + $0x228] sm:$0xf]  ;;  %v2934_v47 = vld [vmem:[#allocation5 + $0xec] sm:$0xf] }
  0x72   :  { %1434 = vmatpush.bf16.msra.mxu3 %v2524_v52  ;;  %v2064_v49 = vor.u32 %v2924_v41, %v2063_v40  ;;  %v2956_v52 = vld [vmem:[#allocation5 + $0x194] sm:$0xf0]  ;;  %v2399_v23 = vld [vmem:[#allocation5 + $0x328] sm:$0xf]  ;;  %v2272_v29 = vor.u32 %v2976_v21, %v2271_v20  ;;  %v2113_v48 = vld [vmem:[#allocation5 + $0xf8] sm:$0xf0] }
  0x73   :  { %1409 = vmatpush.bf16.msra.mxu0 %v2252_v0  ;;  %v2192_v61 = vor.u32 %v2956_v52, %v2191_v50  ;;  %v2048_v0 = vor.u32 %v2920_v56, %v2047_v54  ;;  %v3008_v24 = vld [vmem:[#allocation5 + $0x334] sm:$0xf0]  ;;  %v2143_v26 = vld [vmem:[#allocation5 + $0x128] sm:$0xf]  ;;  %v2116_v63 = vor.u32 %v2934_v47, %v2113_v48 }
  0x74   :  { %1422 = vmatpush.bf16.msra.mxu1 %v2380_v1  ;;  %v2175_v1 = vld [vmem:[#allocation5 + $0x168] sm:$0xf]  ;;  %v2944_v27 = vld [vmem:[#allocation5 + $0x134] sm:$0xf0]  ;;  %v2400_v34 = vor.u32 %v3008_v24, %v2399_v23  ;;  %v2209_v23 = vld [vmem:[#allocation5 + $0x1b8] sm:$0xf0] }
  0x75   :  { %1447 = vmatpush.bf16.msrb.mxu2 %v2652_v60  ;;  %v2984_v60 = vld [vmem:[#allocation5 + $0x274] sm:$0xf0]  ;;  %v2176_v10 = vor.u32 %v2952_v2, %v2175_v1  ;;  %v2255_v37 = vld [vmem:[#allocation5 + $0x208] sm:$0xf]  ;;  %v2144_v40 = vor.u32 %v2944_v27, %v2143_v26  ;;  %v2930_v1 = vld [vmem:[#allocation5 + $0xcc] sm:$0xf] }
  0x76   :  { %1435 = vmatpush.bf16.msra.mxu3 %v2508_v4  ;;  %1410 = vmatmul.bf16.vlgmr.msra.gmra.mxu0 %v3322_v51  ;;  %v2304_v3 = vor.u32 %v2984_v60, %v2303_v59  ;;  %v2031_v4 = vld [vmem:[#allocation5 + $0x48] sm:$0xf]  ;;  %v2908_v31 = vld [vmem:[#allocation5 + $0x14] sm:$0xf0]  ;;  %v2966_v60 = vld [vmem:[#allocation5 + $0x1ec] sm:$0xf] }
  0x77   :  { %1493 = vmatpush.bf16.msrb.mxu0 %v2368_v12  ;;  %1423 = vmatmul.bf16.vlgmr.msra.gmra.mxu1 %v3326_v57  ;;  %v3012_v12 = vld [vmem:[#allocation5 + $0x354] sm:$0xf0]  ;;  %v2751_v52 = vld [vmem:[#allocation5 + $0x5e8] sm:$0xf]  ;;  %v2097_v2 = vld [vmem:[#allocation5 + $0xd8] sm:$0xf0] }
  0x78   :  { %1467 = vmatpush.bf16.msrb.mxu1 %v2112_v5  ;;  %v2916_v5 = vld [vmem:[#allocation5 + $0x54] sm:$0xf0]  ;;  %v2607_v54 = vld [vmem:[#allocation5 + $0x4c8] sm:$0xf]  ;;  %v2922_v26 = vld [vmem:[#allocation5 + $0x8c] sm:$0xf] }
  0x79   :  { %1448 = vmatpush.bf16.msrb.mxu2 %v2636_v13  ;;  %1436 = vmatmul.bf16.vlgmr.msra.gmra.mxu3 %v3338_v30  ;;  %v2032_v13 = vor.u32 %v2916_v5, %v2031_v4  ;;  %v3064_v33 = vld [vmem:[#allocation5 + $0x4f4] sm:$0xf0]  ;;  %v2735_v5 = vld [vmem:[#allocation5 + $0x5c8] sm:$0xf]  ;;  %v2065_v27 = vld [vmem:[#allocation5 + $0x98] sm:$0xf0] }
  0x7a   :  { %1461 = vmatpush.bf16.msrb.mxu3 %v2764_v9  ;;  %v2980_v9 = vld [vmem:[#allocation5 + $0x254] sm:$0xf0]  ;;  %v2575_v20 = vld [vmem:[#allocation5 + $0x488] sm:$0xf] }
  0x7b   :  { %1494 = vmatpush.bf16.msrb.mxu0 %v2352_v25  ;;  %v2016_v25 = vor.u32 %v2912_v18, %v2015_v17  ;;  %v2972_v38 = vld [vmem:[#allocation5 + $0x214] sm:$0xf0]  ;;  %v2719_v18 = vld [vmem:[#allocation5 + $0x5a8] sm:$0xf] }
  0x7c   :  { %1468 = vmatpush.bf16.msrb.mxu1 %v2096_v22  ;;  %1449 = vmatmul.bf16.vlgmr.msrb.gmra.mxu2 %v3340_v35  ;;  %v2160_v22 = vor.u32 %v2948_v15, %v2159_v14  ;;  %v3004_v41 = vld [vmem:[#allocation5 + $0x314] sm:$0xf0]  ;;  %v2256_v50 = vor.u32 %v2972_v38, %v2255_v37  ;;  %v2926_v14 = vld [vmem:[#allocation5 + $0xac] sm:$0xf]  ;;  %v2081_v15 = vld [vmem:[#allocation5 + $0xb8] sm:$0xf0]  ;;  %v2068_v38 = vor.u32 %v2922_v26, %v2065_v27 }
  0x7d   :  { %1506 = vmatpush.bf16.msra.mxu2 %v2496_v16  ;;  %v2288_v16 = vor.u32 %v2980_v9, %v2287_v8  ;;  %v3100_v43 = vld [vmem:[#allocation5 + $0x614] sm:$0xf0]  ;;  %v2591_v8 = vld [vmem:[#allocation5 + $0x4a8] sm:$0xf]  ;;  %v2084_v24 = vor.u32 %v2926_v14, %v2081_v15  ;;  %v2193_v37 = vld [vmem:[#allocation5 + $0x198] sm:$0xf0] }
  0x7e   :  { %1480 = vmatpush.bf16.msra.mxu3 %v2240_v19  ;;  %v2416_v19 = vor.u32 %v3012_v12, %v2415_v11  ;;  %v3056_v9 = vld [vmem:[#allocation5 + $0x4b4] sm:$0xf0]  ;;  %v2225_v11 = vld [vmem:[#allocation5 + $0x1d8] sm:$0xf0]  ;;  %v2100_v12 = vor.u32 %v2930_v1, %v2097_v2  ;;  %v2543_v47 = vld [vmem:[#allocation5 + $0x448] sm:$0xf] }
  0x7f   :  { %1495 = vmatpush.bf16.msrb.mxu0 %v2336_v39  ;;  %v2383_v39 = vld [vmem:[#allocation5 + $0x308] sm:$0xf]  ;;  %v3052_v21 = vld [vmem:[#allocation5 + $0x494] sm:$0xf0]  ;;  %v2161_v1 = vld [vmem:[#allocation5 + $0x158] sm:$0xf0] }
  0x80   :  { %1469 = vmatpush.bf16.msrb.mxu1 %v2080_v36  ;;  %v2127_v36 = vld [vmem:[#allocation5 + $0x108] sm:$0xf]  ;;  %v2384_v56 = vor.u32 %v3004_v41, %v2383_v39  ;;  %v2049_v41 = vld [vmem:[#allocation5 + $0x78] sm:$0xf0]  ;;  %v3044_v48 = vld [vmem:[#allocation5 + $0x454] sm:$0xf0] }
  0x81   :  { %1507 = vmatpush.bf16.msra.mxu2 %v2480_v28  ;;  %v1999_v28 = vld [vmem:[#allocation5 + $0x8] sm:$0xf]  ;;  %v2145_v14 = vld [vmem:[#allocation5 + $0x138] sm:$0xf0] }
  0x82   :  { %1481 = vmatpush.bf16.msra.mxu3 %v2224_v32  ;;  %v2623_v32 = vld [vmem:[#allocation5 + $0x4e8] sm:$0xf]  ;;  %v2000_v44 = vor.u32 %v2908_v31, %v1999_v28  ;;  %v2576_v28 = vor.u32 %v3052_v21, %v2575_v20  ;;  %v2906_v20 = vld [vmem:[#allocation5 + $0xc] sm:$0xf]  ;;  %v2001_v21 = vld [vmem:[#allocation5 + $0x18] sm:$0xf0] }
  0x83   :  { %1496 = vmatpush.bf16.msrb.mxu0 %v2320_v53  ;;  %v3096_v53 = vld [vmem:[#allocation5 + $0x5f4] sm:$0xf0]  ;;  %v2703_v31 = vld [vmem:[#allocation5 + $0x588] sm:$0xf]  ;;  %v2497_v26 = vld [vmem:[#allocation5 + $0x3f8] sm:$0xf0] }
  0x84   :  { %1470 = vmatpush.bf16.msrb.mxu1 %v2064_v49  ;;  %v2624_v49 = vor.u32 %v3064_v33, %v2623_v32  ;;  %v3084_v32 = vld [vmem:[#allocation5 + $0x594] sm:$0xf0]  ;;  %v2559_v33 = vld [vmem:[#allocation5 + $0x468] sm:$0xf] }
  0x85   :  { %1508 = vmatpush.bf16.msra.mxu2 %v2464_v42  ;;  %v2767_v42 = vld [vmem:[#allocation5 + $0x608] sm:$0xf]  ;;  %v2704_v39 = vor.u32 %v3084_v32, %v2703_v31  ;;  %v2994_v31 = vld [vmem:[#allocation5 + $0x2cc] sm:$0xf]  ;;  %v2004_v32 = vor.u32 %v2906_v20, %v2001_v21 }
  0x86   :  { %1482 = vmatpush.bf16.msra.mxu3 %v2208_v46  ;;  %v2940_v46 = vld [vmem:[#allocation5 + $0x114] sm:$0xf0]  ;;  %v2768_v59 = vor.u32 %v3100_v43, %v2767_v42  ;;  %v3014_v20 = vld [vmem:[#allocation5 + $0x36c] sm:$0xf] }
  0x87   :  { %1497 = vmatpush.bf16.msrb.mxu0 %v2304_v3  ;;  %v2128_v62 = vor.u32 %v2940_v46, %v2127_v36  ;;  %v2954_v36 = vld [vmem:[#allocation5 + $0x18c] sm:$0xf]  ;;  %v3080_v46 = vld [vmem:[#allocation5 + $0x574] sm:$0xf0] }
  0x88   :  { %1471 = vmatpush.bf16.msrb.mxu1 %v2048_v0  ;;  %v2752_v0 = vor.u32 %v3096_v53, %v2751_v52  ;;  %v2196_v43 = vor.u32 %v2954_v36, %v2193_v37  ;;  %v2129_v36 = vld [vmem:[#allocation5 + $0x118] sm:$0xf0] }
  0x89   :  { %1509 = vmatpush.bf16.msra.mxu2 %v2448_v58  ;;  %2774 = vmatmul.msk.bf16.vlgmr.msrb.gmra.mxu3 %vm1281_vm0, %v3334_v45  ;;  %v3060_v58 = vld [vmem:[#allocation5 + $0x4d4] sm:$0xf0] }
  0x8a   :  { %1483 = vmatpush.bf16.msra.mxu3 %v2192_v61  ;;  %v2241_v61 = vld [vmem:[#allocation5 + $0x1f8] sm:$0xf0]  ;;  %v2608_v3 = vor.u32 %v3060_v58, %v2607_v54  ;;  %v2914_v54 = vld [vmem:[#allocation5 + $0x4c] sm:$0xf]  ;;  %v2544_v58 = vor.u32 %v3044_v48, %v2543_v47 }
  0x8b   :  { %1498 = vmatpush.bf16.msrb.mxu0 %v2288_v16  ;;  %v2244_v4 = vor.u32 %v2966_v60, %v2241_v61  ;;  %v2592_v16 = vor.u32 %v3056_v9, %v2591_v8  ;;  %v2671_v60 = vld [vmem:[#allocation5 + $0x548] sm:$0xf]  ;;  %v3076_v61 = vld [vmem:[#allocation5 + $0x554] sm:$0xf0]  ;;  %v3058_v47 = vld [vmem:[#allocation5 + $0x4cc] sm:$0xf] }
  0x8c   :  { %1472 = vmatpush.bf16.msrb.mxu1 %v2032_v13  ;;  %v2655_v9 = vld [vmem:[#allocation5 + $0x528] sm:$0xf]  ;;  %v2609_v48 = vld [vmem:[#allocation5 + $0x4d8] sm:$0xf0] }
  0x8d   :  { %1510 = vmatpush.bf16.msra.mxu2 %v2432_v6  ;;  %v3092_v6 = vld [vmem:[#allocation5 + $0x5d4] sm:$0xf0] }
  0x8e   :  { %1484 = vmatpush.bf16.msra.mxu3 %v2176_v10  ;;  %v2962_v10 = vld [vmem:[#allocation5 + $0x1cc] sm:$0xf]  ;;  %v2736_v13 = vor.u32 %v3092_v6, %v2735_v5  ;;  %v2017_v5 = vld [vmem:[#allocation5 + $0x38] sm:$0xf0] }
  0x8f   :  { %1499 = vmatpush.bf16.msrb.mxu0 %v2272_v29  ;;  %v2228_v17 = vor.u32 %v2962_v10, %v2225_v11  ;;  %v3072_v10 = vld [vmem:[#allocation5 + $0x534] sm:$0xf0]  ;;  %v2511_v11 = vld [vmem:[#allocation5 + $0x408] sm:$0xf] }
  0x90   :  { %1473 = vmatpush.bf16.msrb.mxu1 %v2016_v25 }
  0x91   :  { %1511 = vmatpush.bf16.msra.mxu2 %v2416_v19  ;;  %v3088_v19 = vld [vmem:[#allocation5 + $0x5b4] sm:$0xf0] }
  0x92   :  { %1485 = vmatpush.bf16.msra.mxu3 %v2160_v22  ;;  %v2958_v22 = vld [vmem:[#allocation5 + $0x1ac] sm:$0xf]  ;;  %v2720_v25 = vor.u32 %v3088_v19, %v2719_v18  ;;  %v2656_v18 = vor.u32 %v3072_v10, %v2655_v9  ;;  %v2639_v19 = vld [vmem:[#allocation5 + $0x508] sm:$0xf]  ;;  %v2449_v10 = vld [vmem:[#allocation5 + $0x398] sm:$0xf0] }
  0x93   :  { %1500 = vmatpush.bf16.msrb.mxu0 %v2256_v50  ;;  %v2212_v29 = vor.u32 %v2958_v22, %v2209_v23  ;;  %v2177_v50 = vld [vmem:[#allocation5 + $0x178] sm:$0xf0] }
  0x94   :  { %1474 = vmatpush.bf16.msrb.mxu1 %v2000_v44  ;;  %v2687_v44 = vld [vmem:[#allocation5 + $0x568] sm:$0xf] }
  0x95   :  { %1512 = vmatpush.bf16.msra.mxu2 %v2400_v34  ;;  %v3048_v34 = vld [vmem:[#allocation5 + $0x474] sm:$0xf0]  ;;  %v2688_v53 = vor.u32 %v3080_v46, %v2687_v44  ;;  %v2481_v46 = vld [vmem:[#allocation5 + $0x3d8] sm:$0xf0] }
  0x96   :  { %1486 = vmatpush.bf16.msra.mxu3 %v2144_v40  ;;  %1501 = vmatmul.bf16.vlgmr.msrb.gmra.mxu0 %v3322_v51  ;;  %v2918_v40 = vld [vmem:[#allocation5 + $0x6c] sm:$0xf]  ;;  %v2560_v42 = vor.u32 %v3048_v34, %v2559_v33  ;;  %v2353_v33 = vld [vmem:[#allocation5 + $0x2d8] sm:$0xf0] }
  0x97   :  { %1552 = vmatpush.bf16.msra.mxu0 %v2768_v59  ;;  %1475 = vmatmul.bf16.vlgmr.msrb.gmra.mxu1 %v3324_v55  ;;  %v2052_v52 = vor.u32 %v2918_v40, %v2049_v41  ;;  %v2938_v34 = vld [vmem:[#allocation5 + $0x10c] sm:$0xf] }
  0x98   :  { %1519 = vmatpush.bf16.msra.mxu1 %v2624_v49  ;;  %v2950_v49 = vld [vmem:[#allocation5 + $0x16c] sm:$0xf]  ;;  %v2132_v44 = vor.u32 %v2938_v34, %v2129_v36 }
  0x99   :  { %1513 = vmatpush.bf16.msra.mxu2 %v2384_v56  ;;  %v2033_v56 = vld [vmem:[#allocation5 + $0x58] sm:$0xf0]  ;;  %v2180_v59 = vor.u32 %v2950_v49, %v2177_v50  ;;  %v2990_v50 = vld [vmem:[#allocation5 + $0x2ac] sm:$0xf] }
  0x9a   :  { %1487 = vmatpush.bf16.msra.mxu3 %v2128_v62  ;;  %v2527_v62 = vld [vmem:[#allocation5 + $0x428] sm:$0xf]  ;;  %v2036_v2 = vor.u32 %v2914_v54, %v2033_v56  ;;  %v2737_v54 = vld [vmem:[#allocation5 + $0x5d8] sm:$0xf0]  ;;  %v3010_v34 = vld [vmem:[#allocation5 + $0x34c] sm:$0xf] }
  0x9b   :  { %1571 = vmatpush.bf16.msrb.mxu0 %v2244_v4  ;;  %v2910_v4 = vld [vmem:[#allocation5 + $0x2c] sm:$0xf] }
  0x9c   :  { %1520 = vmatpush.bf16.msra.mxu1 %v2608_v3  ;;  %1514 = vmatmul.bf16.vlgmr.msra.gmra.mxu2 %v3326_v57  ;;  %v2672_v3 = vor.u32 %v3076_v61, %v2671_v60  ;;  %v2020_v15 = vor.u32 %v2910_v4, %v2017_v5  ;;  %v2465_v61 = vld [vmem:[#allocation5 + $0x3b8] sm:$0xf0] }
  0x9d   :  { %1558 = vmatpush.bf16.msrb.mxu2 %v2116_v63  ;;  %1488 = vmatmul.bf16.vlgmr.msra.gmra.mxu3 %v3330_v7  ;;  %v3040_v63 = vld [vmem:[#allocation5 + $0x434] sm:$0xf0]  ;;  %v2721_v4 = vld [vmem:[#allocation5 + $0x5b8] sm:$0xf0] }
  0x9e   :  { %1532 = vmatpush.bf16.msrb.mxu3 %v2752_v0  ;;  %v2946_v0 = vld [vmem:[#allocation5 + $0x14c] sm:$0xf]  ;;  %v2528_v6 = vor.u32 %v3040_v63, %v2527_v62  ;;  %v2593_v63 = vld [vmem:[#allocation5 + $0x4b8] sm:$0xf0] }
  0x9f   :  { %1572 = vmatpush.bf16.msrb.mxu0 %v2228_v17  ;;  %v2164_v8 = vor.u32 %v2946_v0, %v2161_v1  ;;  %v2369_v17 = vld [vmem:[#allocation5 + $0x2f8] sm:$0xf0]  ;;  %v3054_v62 = vld [vmem:[#allocation5 + $0x4ac] sm:$0xf] }
  0xa0   :  { %1521 = vmatpush.bf16.msra.mxu1 %v2592_v16  ;;  %v2998_v16 = vld [vmem:[#allocation5 + $0x2ec] sm:$0xf] }
  0xa1   :  { %1559 = vmatpush.bf16.msrb.mxu2 %v2100_v12  ;;  %v3036_v12 = vld [vmem:[#allocation5 + $0x414] sm:$0xf0]  ;;  %v2372_v27 = vor.u32 %v2998_v16, %v2369_v17  ;;  %v2986_v1 = vld [vmem:[#allocation5 + $0x28c] sm:$0xf]  ;;  %v2705_v17 = vld [vmem:[#allocation5 + $0x598] sm:$0xf0] }
  0xa2   :  { %1533 = vmatpush.bf16.msrb.mxu3 %v2736_v13  ;;  %v2942_v13 = vld [vmem:[#allocation5 + $0x12c] sm:$0xf]  ;;  %v2512_v22 = vor.u32 %v3036_v12, %v2511_v11  ;;  %v2577_v12 = vld [vmem:[#allocation5 + $0x498] sm:$0xf0] }
  0xa3   :  { %1573 = vmatpush.bf16.msrb.mxu0 %v2212_v29  ;;  %v2148_v23 = vor.u32 %v2942_v13, %v2145_v14  ;;  %v2625_v29 = vld [vmem:[#allocation5 + $0x4f8] sm:$0xf0]  ;;  %v3050_v11 = vld [vmem:[#allocation5 + $0x48c] sm:$0xf] }
  0xa4   :  { %1522 = vmatpush.bf16.msra.mxu1 %v2576_v28  ;;  %v3062_v28 = vld [vmem:[#allocation5 + $0x4ec] sm:$0xf] }
  0xa5   :  { %1560 = vmatpush.bf16.msrb.mxu2 %v2084_v24  ;;  %v3068_v24 = vld [vmem:[#allocation5 + $0x514] sm:$0xf0]  ;;  %v2628_v41 = vor.u32 %v3062_v28, %v2625_v29  ;;  %v2982_v14 = vld [vmem:[#allocation5 + $0x26c] sm:$0xf]  ;;  %v2689_v29 = vld [vmem:[#allocation5 + $0x578] sm:$0xf0] }
  0xa6   :  { %1534 = vmatpush.bf16.msrb.mxu3 %v2720_v25  ;;  %2775 = vmatmul.msk.bf16.vlgmr.msra.gmra.mxu0 %vm1281_vm0, %v3334_v45  ;;  %v3030_v25 = vld [vmem:[#allocation5 + $0x3ec] sm:$0xf]  ;;  %v2640_v37 = vor.u32 %v3068_v24, %v2639_v19  ;;  %v2580_v19 = vor.u32 %v3050_v11, %v2577_v12  ;;  %v2561_v24 = vld [vmem:[#allocation5 + $0x478] sm:$0xf0] }
  0xa7   :  { %1574 = vmatpush.bf16.msrb.mxu0 %v2196_v43  ;;  %v2500_v40 = vor.u32 %v3030_v25, %v2497_v26  ;;  %v2356_v43 = vor.u32 %v2994_v31, %v2353_v33  ;;  %v2978_v26 = vld [vmem:[#allocation5 + $0x24c] sm:$0xf] }
  0xa8   :  { %1523 = vmatpush.bf16.msra.mxu1 %v2560_v42  ;;  %v3026_v42 = vld [vmem:[#allocation5 + $0x3cc] sm:$0xf] }
  0xa9   :  { %1561 = vmatpush.bf16.msrb.mxu2 %v2068_v38  ;;  %v3094_v38 = vld [vmem:[#allocation5 + $0x5ec] sm:$0xf]  ;;  %v2484_v56 = vor.u32 %v3026_v42, %v2481_v46 }
  0xaa   :  { %1535 = vmatpush.bf16.msrb.mxu3 %v2704_v39  ;;  %v2753_v39 = vld [vmem:[#allocation5 + $0x5f8] sm:$0xf0]  ;;  %v3078_v28 = vld [vmem:[#allocation5 + $0x56c] sm:$0xf] }
  0xab   :  { %1575 = vmatpush.bf16.msrb.mxu0 %v2180_v59  ;;  %v2756_v49 = vor.u32 %v3094_v38, %v2753_v39  ;;  %v3022_v59 = vld [vmem:[#allocation5 + $0x3ac] sm:$0xf]  ;;  %v2417_v38 = vld [vmem:[#allocation5 + $0x358] sm:$0xf0] }
  0xac   :  { %1524 = vmatpush.bf16.msra.mxu1 %v2544_v58  ;;  %v2612_v58 = vor.u32 %v3058_v47, %v2609_v48  ;;  %v2468_v5 = vor.u32 %v3022_v59, %v2465_v61  ;;  %v3042_v39 = vld [vmem:[#allocation5 + $0x44c] sm:$0xf]  ;;  %v2673_v47 = vld [vmem:[#allocation5 + $0x558] sm:$0xf0]  ;;  %v2420_v48 = vor.u32 %v3010_v34, %v2417_v38 }
  0xad   :  { %1562 = vmatpush.bf16.msrb.mxu2 %v2052_v52  ;;  %v2337_v52 = vld [vmem:[#allocation5 + $0x2b8] sm:$0xf0]  ;;  %v2974_v42 = vld [vmem:[#allocation5 + $0x22c] sm:$0xf] }
  0xae   :  { %1536 = vmatpush.bf16.msrb.mxu3 %v2688_v53  ;;  %v3090_v53 = vld [vmem:[#allocation5 + $0x5cc] sm:$0xf]  ;;  %v2340_v60 = vor.u32 %v2990_v50, %v2337_v52 }
  0xaf   :  { %1576 = vmatpush.bf16.msrb.mxu0 %v2164_v8  ;;  %v2740_v0 = vor.u32 %v3090_v53, %v2737_v54  ;;  %v3018_v8 = vld [vmem:[#allocation5 + $0x38c] sm:$0xf]  ;;  %v2401_v53 = vld [vmem:[#allocation5 + $0x338] sm:$0xf0] }
  0xb0   :  { %1525 = vmatpush.bf16.msra.mxu1 %v2528_v6  ;;  %v2596_v6 = vor.u32 %v3054_v62, %v2593_v63  ;;  %v3074_v46 = vld [vmem:[#allocation5 + $0x54c] sm:$0xf]  ;;  %v2657_v63 = vld [vmem:[#allocation5 + $0x538] sm:$0xf0] }
  0xb1   :  { %1563 = vmatpush.bf16.msrb.mxu2 %v2036_v2  ;;  %v2321_v2 = vld [vmem:[#allocation5 + $0x298] sm:$0xf0]  ;;  %v3006_v50 = vld [vmem:[#allocation5 + $0x32c] sm:$0xf] }
  0xb2   :  { %1537 = vmatpush.bf16.msrb.mxu3 %v2672_v3  ;;  %v3086_v3 = vld [vmem:[#allocation5 + $0x5ac] sm:$0xf]  ;;  %v2324_v9 = vor.u32 %v2986_v1, %v2321_v2  ;;  %v2769_v1 = vld [vmem:[#allocation5 + $0x618] sm:$0xf0] }
  0xb3   :  { %1577 = vmatpush.bf16.msrb.mxu0 %v2148_v23  ;;  %v2724_v13 = vor.u32 %v3086_v3, %v2721_v4  ;;  %v3362_v16 = vpop.f32.mrf.mxu0  ;;  %v3046_v23 = vld [vmem:[#allocation5 + $0x46c] sm:$0xf]  ;;  %v2404_v3 = vor.u32 %v3006_v50, %v2401_v53 }
  0xb4   :  { %1526 = vmatpush.bf16.msra.mxu1 %v2512_v22  ;;  %v2433_v22 = vld [vmem:[#allocation5 + $0x378] sm:$0xf0]  ;;  %v2564_v33 = vor.u32 %v3046_v23, %v2561_v24  ;;  %v3038_v54 = vld [vmem:[#allocation5 + $0x42c] sm:$0xf] }
  0xb5   :  { %1564 = vmatpush.bf16.msrb.mxu2 %v2020_v15  ;;  %v2305_v15 = vld [vmem:[#allocation5 + $0x278] sm:$0xf0]  ;;  %v2970_v59 = vld [vmem:[#allocation5 + $0x20c] sm:$0xf] }
  0xb6   :  { %1538 = vmatpush.bf16.msrb.mxu3 %v2656_v18  ;;  %v2452_v18 = vor.u32 %v3018_v8, %v2449_v10  ;;  %v2308_v21 = vor.u32 %v2982_v14, %v2305_v15  ;;  %v3070_v61 = vld [vmem:[#allocation5 + $0x52c] sm:$0xf]  ;;  %v3116_v24 = vld [vmem:[#allocation8 + $0x78] sm:$0xff] }
  0xb7   :  { %1527 = vmatmul.bf16.vlgmr.msra.gmra.mxu1 %v3338_v30  ;;  %1578 = vmatpush.bf16.msrb.mxu0 %v2132_v44  ;;  %v3002_v8 = vld [vmem:[#allocation5 + $0x30c] sm:$0xf]  ;;  %v2660_v11 = vor.u32 %v3070_v61, %v2657_v63 }
  0xb8   :  { %1584 = vmatpush.bf16.msrb.mxu1 %v2372_v27  ;;  %v2289_v27 = vld [vmem:[#allocation5 + $0x258] sm:$0xf0]  ;;  %v3034_v12 = vld [vmem:[#allocation5 + $0x40c] sm:$0xf] }
  0xb9   :  { %1565 = vmatpush.bf16.msrb.mxu2 %v2004_v32  ;;  %v2436_v32 = vor.u32 %v3014_v20, %v2433_v22  ;;  %v2292_v36 = vor.u32 %v2978_v26, %v2289_v27  ;;  %v3066_v15 = vld [vmem:[#allocation5 + $0x50c] sm:$0xf]  ;;  %v3108_v20 = vld [vmem:[#allocation8 + $0x38] sm:$0xff] }
  0xba   :  { %1539 = vmatpush.bf16.msrb.mxu3 %v2640_v37  ;;  %1579 = vmatmul.bf16.vlgmr.msrb.gmra.mxu0 %v3330_v7  ;;  %v3364_v25 = vpop.f32.mrf.mxu1  ;;  %v3114_v34 = vld [vmem:[#allocation8 + $0x68] sm:$0xff] }
  0xbb   :  { %1623 = vmatpush.bf16.msra.mxu0 %v2756_v49  ;;  %v3366_v31 = vpop.f32.mrf.mxu2  ;;  %v1296_v44 = vpop.f32.mrf.mxu0  ;;  %v3110_v50 = vld [vmem:[#allocation8 + $0x48] sm:$0xff] }
  0xbc   :  { %1585 = vmatpush.bf16.msrb.mxu1 %v2356_v43  ;;  %1566 = vmatmul.bf16.vlgmr.msrb.gmra.mxu2 %v3324_v55  ;;  %v3082_v55 = vld [vmem:[#allocation5 + $0x58c] sm:$0xf]  ;;  %v2273_v43 = vld [vmem:[#allocation5 + $0x238] sm:$0xf0] }
  0xbd   :  { %1610 = vmatpush.bf16.msra.mxu2 %v2628_v41  ;;  %1540 = vmatmul.bf16.vlgmr.msrb.gmra.mxu3 %v3340_v35  ;;  %v2708_v7 = vor.u32 %v3082_v55, %v2705_v17  ;;  %v2692_v41 = vor.u32 %v3078_v28, %v2689_v29  ;;  %v2276_v52 = vor.u32 %v2974_v42, %v2273_v43  ;;  %v2641_v55 = vld [vmem:[#allocation5 + $0x518] sm:$0xf0]  ;;  %v3102_v43 = vld [vmem:[#allocation8 + $0x8] sm:$0xff] }
  0xbe   :  { %1597 = vmatpush.bf16.msra.mxu3 %v2500_v40  ;;  %v3368_v37 = vpop.f32.mrf.mxu3  ;;  %v2545_v40 = vld [vmem:[#allocation5 + $0x458] sm:$0xf0] }
  0xbf   :  { %1624 = vmatpush.bf16.msra.mxu0 %v2740_v0  ;;  %v2548_v49 = vor.u32 %v3042_v39, %v2545_v40  ;;  %v3098_v0 = vld [vmem:[#allocation5 + $0x60c] sm:$0xf]  ;;  %v3112_v42 = vld [vmem:[#allocation8 + $0x58] sm:$0xff] }
  0xc0   :  { %1586 = vmatpush.bf16.msrb.mxu1 %v2340_v60  ;;  %v2257_v60 = vld [vmem:[#allocation5 + $0x218] sm:$0xf0]  ;;  %v2772_v14 = vor.u32 %v3098_v0, %v2769_v1 }
  0xc1   :  { %1611 = vmatpush.bf16.msra.mxu2 %v2612_v58  ;;  %v2676_v58 = vor.u32 %v3074_v46, %v2673_v47  ;;  %v3101_v47 = vld [vmem:[#allocation8] sm:$0xff]  ;;  %v3124_v1 = vld [vmem:[#allocation8 + $0xb8] sm:$0xff] }
  0xc2   :  { %1598 = vmatpush.bf16.msra.mxu3 %v2484_v56  ;;  %v2529_v56 = vld [vmem:[#allocation5 + $0x438] sm:$0xf0]  ;;  %v1309_v62 = vpop.f32.mrf.mxu1 }
  0xc3   :  { %1625 = vmatpush.bf16.msra.mxu0 %v2724_v13  ;;  %v1322_v2 = vpop.f32.mrf.mxu2  ;;  %v2532_v4 = vor.u32 %v3038_v54, %v2529_v56  ;;  %v2513_v13 = vld [vmem:[#allocation5 + $0x418] sm:$0xf0] }
  0xc4   :  { %1587 = vmatpush.bf16.msrb.mxu1 %v2324_v9  ;;  %v2385_v9 = vld [vmem:[#allocation5 + $0x318] sm:$0xf0]  ;;  %v3123_v2 = vld [vmem:[#allocation8 + $0xb0] sm:$0xff] }
  0xc5   :  { %1612 = vmatpush.bf16.msra.mxu2 %v2596_v6  ;;  %v2260_v6 = vor.u32 %v2970_v59, %v2257_v60 }
  0xc6   :  { %1599 = vmatpush.bf16.msra.mxu3 %v2468_v5  ;;  %v3370_v5 = vld [vmem:[#allocation7] sm:$0xf]  ;;  %v1335_v10 = vpop.f32.mrf.mxu3 }
  0xc7   :  { %1626 = vmatpush.bf16.msra.mxu0 %v2708_v7  ;;  %v293_v17 = vperm.slane %v3370_v5, 0  ;;  %v3107_v7 = vld [vmem:[#allocation8 + $0x30] sm:$0xff]  ;;  %v294_v54 = vperm.slane %v3370_v5, 1 }
  0xc8   :  { %1588 = vmatpush.bf16.msrb.mxu1 %v2308_v21  ;;  %v2644_v21 = vor.u32 %v3066_v15, %v2641_v55  ;;  %v3120_v55 = vld [vmem:[#allocation8 + $0x98] sm:$0xff] }
  0xc9   :  { %1613 = vmatpush.bf16.msra.mxu2 %v2580_v19  ;;  %v2516_v19 = vor.u32 %v3034_v12, %v2513_v13  ;;  %v1295_v22 = vadd.f32 %v3362_v16, %v293_v17  ;;  %v3106_v16 = vld [vmem:[#allocation8 + $0x28] sm:$0xff]  ;;  %v3119_v17 = vld [vmem:[#allocation8 + $0x90] sm:$0xff] }
  0xca   :  { %1600 = vmatpush.bf16.msra.mxu3 %v2452_v18  ;;  %v2388_v18 = vor.u32 %v3002_v8, %v2385_v9  ;;  %v3122_v9 = vld [vmem:[#allocation8 + $0xa8] sm:$0xff] }
  0xcb   :  { %1627 = vmatpush.bf16.msra.mxu0 %v2692_v41  ;;  %v1372_v23 = vpop.f32.mrf.mxu2  ;;  %v1308_v26 = vadd.f32 %v3364_v25, %v1295_v22  ;;  %v3104_v25 = vld [vmem:[#allocation8 + $0x18] sm:$0xff] }
  0xcc   :  { %1589 = vmatpush.bf16.msrb.mxu1 %v2292_v36 }
  0xcd   :  { %1614 = vmatpush.bf16.msra.mxu2 %v2564_v33  ;;  %v1321_v28 = vadd.f32 %v3366_v31, %v1308_v26  ;;  %v3105_v33 = vld [vmem:[#allocation8 + $0x20] sm:$0xff]  ;;  %v3103_v31 = vld [vmem:[#allocation8 + $0x10] sm:$0xff] }
  0xce   :  { %1601 = vmatpush.bf16.msra.mxu3 %v2436_v32  ;;  %v3117_v26 = vld [vmem:[#allocation8 + $0x80] sm:$0xff] }
  0xcf   :  { %1628 = vmatpush.bf16.msra.mxu0 %v2676_v58 }
  0xd0   :  { %1590 = vmatpush.bf16.msrb.mxu1 %v2276_v52  ;;  %v3109_v52 = vld [vmem:[#allocation8 + $0x40] sm:$0xff] }
  0xd1   :  { %1615 = vmatpush.bf16.msra.mxu2 %v2548_v49 }
  0xd2   :  { %1602 = vmatpush.bf16.msra.mxu3 %v2420_v48 }
  0xd3   :  { %1629 = vmatpush.bf16.msra.mxu0 %v2660_v11  ;;  %v1346_v27 = vpop.f32.mrf.mxu0  ;;  %v1374_v32 = vpop.f32.mrf.mxu2  ;;  %v3121_v11 = vld [vmem:[#allocation8 + $0xa0] sm:$0xff] }
  0xd4   :  { %1591 = vmatpush.bf16.msrb.mxu1 %v2260_v6  ;;  %v1359_v29 = vpop.f32.mrf.mxu1 }
  0xd5   :  { %1616 = vmatpush.bf16.msra.mxu2 %v2532_v4 }
  0xd6   :  { %1603 = vmatpush.bf16.msra.mxu3 %v2404_v3 }
  0xd7   :  { %1592 = vmatmul.bf16.vlgmr.msrb.gmra.mxu1 %v3322_v51  ;;  %1630 = vmatpush.bf16.msra.mxu0 %v2644_v21  ;;  %v3115_v51 = vld [vmem:[#allocation8 + $0x70] sm:$0xff]  ;;  %v3118_v21 = vld [vmem:[#allocation8 + $0x88] sm:$0xff] }
  0xd8   :  { %1643 = vmatpush.bf16.msra.mxu1 %v2772_v14 }
  0xd9   :  { %1617 = vmatpush.bf16.msra.mxu2 %v2516_v19 }
  0xda   :  { %1604 = vmatpush.bf16.msra.mxu3 %v2388_v18  ;;  %1631 = vmatmul.bf16.vlgmr.msra.gmra.mxu0 %v3340_v35  ;;  %v3113_v35 = vld [vmem:[#allocation8 + $0x60] sm:$0xff] }
  0xdb   :  { %v1348_v38 = vpop.f32.mrf.mxu0 }
  0xdc   :  { %1930 = vmatpush.bf16.msrb.mxu1 %v3116_v24  ;;  %1618 = vmatmul.bf16.vlgmr.msra.gmra.mxu2 %v3338_v30  ;;  %v1385_v36 = vpop.f32.mrf.mxu3  ;;  %v1361_v39 = vpop.f32.mrf.mxu1 }
  0xdd   :  { %1605 = vmatmul.bf16.vlgmr.msra.gmra.mxu3 %v3326_v57  ;;  %v1334_v57 = vadd.f32 %v3368_v37, %v1321_v28  ;;  %v3111_v37 = vld [vmem:[#allocation8 + $0x50] sm:$0xff]  ;;  %v1386_v58 = vadd.f32 %v1385_v36, %v294_v54  ;;  %1943 = vmatpush.bf16.msrb.mxu2 %v3124_v1  ;;  %v296_v54 = vperm.slane %v3370_v5, 3 }
  0xde   :  { %1917 = vmatpush.bf16.msrb.mxu3 %v3108_v20  ;;  %v3131_v28 = vld [vmem:[#allocation8 + $0xf0] sm:$0xff] }
  0xdf   :  { %v1347_v30 = vadd.f32 %v1346_v27, %v1334_v57  ;;  %v1398_v40 = vpop.f32.mrf.mxu2  ;;  %v3130_v57 = vld [vmem:[#allocation8 + $0xe8] sm:$0xff] }
  0xe0   :  { %1931 = vmatpush.bf16.msrb.mxu1 %v3115_v51  ;;  %v1399_v62 = vadd.f32 %v1398_v40, %v1386_v58 }
  0xe1   :  { %v1360_v41 = vadd.f32 %v1359_v29, %v1347_v30  ;;  %1944 = vmatpush.bf16.msrb.mxu2 %v3123_v2  ;;  %v295_v29 = vperm.slane %v3370_v5, 2  ;;  %v3129_v30 = vld [vmem:[#allocation8 + $0xe0] sm:$0xff] }
  0xe2   :  { %1918 = vmatpush.bf16.msrb.mxu3 %v3107_v7 }
  0xe3   :  { %v1373_v44 = vadd.f32 %v1372_v23, %v1360_v41 }
  0xe4   :  { %1932 = vmatpush.bf16.msrb.mxu1 %v3114_v34  ;;  %v1387_v46 = vpop.f32.mrf.mxu3 }
  0xe5   :  { %v1649_v49 = vmax.f32 %v1373_v44, 0.0  ;;  %1945 = vmatpush.bf16.msrb.mxu2 %v3122_v9 }
  0xe6   :  { %1919 = vmatpush.bf16.msrb.mxu3 %v3106_v16  ;;  %v3132_v16 = vld [vmem:[#allocation8 + $0xf8] sm:$0xff] }
  0xe7   :  { %2776 = vmatmul.msk.bf16.vlgmr.msra.gmra.mxu1 %vm1281_vm0, %v3334_v45  ;;  %v1400_v48 = vpop.f32.mrf.mxu2  ;;  %v1653_v45 = vpack.c.bf16 %v1649_v49, %v1649_v49  ;;  %1956 = vmatpush.bf16.msrb.mxu0 %v3132_v16 }
  0xe8   :  { %1933 = vmatpush.bf16.msrb.mxu1 %v3113_v35  ;;  %v3128_v35 = vld [vmem:[#allocation8 + $0xd8] sm:$0xff] }
  0xe9   :  { %1946 = vmatpush.bf16.msrb.mxu2 %v3121_v11 }
  0xea   :  { %1920 = vmatpush.bf16.msrb.mxu3 %v3105_v33 }
  0xeb   :  { %1957 = vmatpush.bf16.msrb.mxu0 %v3131_v28 }
  0xec   :  { %1934 = vmatpush.bf16.msrb.mxu1 %v3112_v42  ;;  %v3127_v42 = vld [vmem:[#allocation8 + $0xd0] sm:$0xff] }
  0xed   :  { %1947 = vmatpush.bf16.msrb.mxu2 %v3120_v55 }
  0xee   :  { %1921 = vmatpush.bf16.msrb.mxu3 %v3104_v25 }
  0xef   :  { %1958 = vmatpush.bf16.msrb.mxu0 %v3130_v57 }
  0xf0   :  { %1935 = vmatpush.bf16.msrb.mxu1 %v3111_v37 }
  0xf1   :  { %1948 = vmatpush.bf16.msrb.mxu2 %v3119_v17 }
  0xf2   :  { %1922 = vmatpush.bf16.msrb.mxu3 %v3103_v31 }
  0xf3   :  { %v1411_v53 = vpop.f32.mrf.mxu0  ;;  %1959 = vmatpush.bf16.msrb.mxu0 %v3129_v30 }
  0xf4   :  { %1936 = vmatpush.bf16.msrb.mxu1 %v3110_v50  ;;  %v1424_v56 = vpop.f32.mrf.mxu1  ;;  %v1412_v0 = vadd.f32 %v1411_v53, %v1399_v62 }
  0xf5   :  { %1949 = vmatpush.bf16.msrb.mxu2 %v3118_v21 }
  0xf6   :  { %1923 = vmatpush.bf16.msrb.mxu3 %v3102_v43  ;;  %v1425_v4 = vadd.f32 %v1424_v56, %v1412_v0 }
  0xf7   :  { %1960 = vmatpush.bf16.msrb.mxu0 %v3128_v35 }
  0xf8   :  { %1937 = vmatpush.bf16.msrb.mxu1 %v3109_v52 }
  0xf9   :  { %1950 = vmatpush.bf16.msrb.mxu2 %v3117_v26 }
  0xfa   :  { %1924 = vmatpush.bf16.msrb.mxu3 %v3101_v47  ;;  %v3126_v47 = vld [vmem:[#allocation8 + $0xc8] sm:$0xff] }
  0xfb   :  { %v1413_v60 = vpop.f32.mrf.mxu0  ;;  %1961 = vmatpush.bf16.msrb.mxu0 %v3127_v42 }
  0xfc   :  { %v1437_v59 = vpop.f32.mrf.mxu3  ;;  %v1426_v63 = vpop.f32.mrf.mxu1 }
  0xfd   :  { %1925 = vmatmul.bf16.vlgmr.msrb.gmra.mxu3 %v1653_v45  ;;  %v1438_v8 = vadd.f32 %v1437_v59, %v1425_v4  ;;  %v3125_v45 = vld [vmem:[#allocation8 + $0xc0] sm:$0xff] }
  0xff   :  { %v1450_v61 = vpop.f32.mrf.mxu2  ;;  %1962 = vmatpush.bf16.msrb.mxu0 %v3126_v47 }
 0x100   :  { %v1451_v10 = vadd.f32 %v1450_v61, %v1438_v8 }
 0x103   :  { %1963 = vmatpush.bf16.msrb.mxu0 %v3125_v45 }
 0x104   :  { %v1439_v3 = vpop.f32.mrf.mxu3 }
 0x107   :  { %v1452_v6 = vpop.f32.mrf.mxu2 }
 0x10c   :  { %v1463_v12 = vpop.f32.mrf.mxu3 }
 0x10d   :  { %v1464_v13 = vadd.f32 %v1463_v12, %v1451_v10 }
 0x10f   :  { %v1650_v14 = vmax.f32 %v1464_v13, 0.0 }
 0x111   :  { %v1654_v15 = vpack.c.bf16 %v1650_v14, %v1650_v14 }
 0x113   :  { %1938 = vmatmul.bf16.vlgmr.msrb.gmra.mxu1 %v1654_v15  ;;  %v1502_v19 = vpop.f32.mrf.mxu0  ;;  %v3142_v15 = vld [vmem:[%s3396_s4] ss:$0 sm:$0xff] }
 0x114   :  { %v1465_v18 = vpop.f32.mrf.mxu3  ;;  %v1476_v20 = vpop.f32.mrf.mxu1 }
 0x115   :  { %v1477_v33 = vadd.f32 %v1476_v20, %v295_v29 }
 0x11b   :  { %v1504_v23 = vpop.f32.mrf.mxu0 }
 0x11c   :  { %v1478_v7 = vpop.f32.mrf.mxu1 }
 0x11f   :  { %v1515_v24 = vpop.f32.mrf.mxu2 }
 0x120   :  { %v1489_v22 = vpop.f32.mrf.mxu3 }
 0x121   :  { %v1490_v25 = vadd.f32 %v1489_v22, %v1477_v33 }
 0x123   :  { %v1554_v51 = vpop.f32.mrf.mxu0  ;;  %v1503_v38 = vadd.f32 %v1502_v19, %v1490_v25 }
 0x125   :  { %v1516_v39 = vadd.f32 %v1515_v24, %v1503_v38 }
 0x127   :  { %v1517_v32 = vpop.f32.mrf.mxu2 }
 0x128   :  { %v1491_v27 = vpop.f32.mrf.mxu3 }
 0x12b   :  { %v1556_v34 = vpop.f32.mrf.mxu0 }
 0x134   :  { %v1528_v36 = vpop.f32.mrf.mxu1 }
 0x135   :  { %v1529_v40 = vadd.f32 %v1528_v36, %v1516_v39 }
 0x137   :  { %v1580_v31 = vpop.f32.mrf.mxu0 }
 0x13c   :  { %v1530_v41 = vpop.f32.mrf.mxu1 }
 0x13f   :  { %v1567_v44 = vpop.f32.mrf.mxu2  ;;  %v1582_v49 = vpop.f32.mrf.mxu0 }
 0x140   :  { %v1541_v43 = vpop.f32.mrf.mxu3  ;;  %v1568_v56 = vadd.f32 %v1567_v44, %v296_v54 }
 0x141   :  { %v1542_v37 = vadd.f32 %v1541_v43, %v1529_v40 }
 0x142   :  { %v1581_v59 = vadd.f32 %v1580_v31, %v1568_v56 }
 0x143   :  { %v1555_v46 = vadd.f32 %v1554_v51, %v1542_v37 }
 0x145   :  { %v1651_v48 = vmax.f32 %v1555_v46, 0.0 }
 0x147   :  { %v1655_v50 = vpack.c.bf16 %v1651_v48, %v1651_v48  ;;  %v1569_v53 = vpop.f32.mrf.mxu2 }
 0x148   :  { %v1543_v52 = vpop.f32.mrf.mxu3 }
 0x149   :  { %1951 = vmatmul.bf16.vlgmr.msrb.gmra.mxu2 %v1655_v50 }
 0x154   :  { %v1593_v58 = vpop.f32.mrf.mxu1 }
 0x155   :  { %v1594_v61 = vadd.f32 %v1593_v58, %v1581_v59 }
 0x157   :  { %v1632_v60 = vpop.f32.mrf.mxu0 }
 0x15c   :  { %v1595_v62 = vpop.f32.mrf.mxu1 }
 0x15f   :  { %v1619_v1 = vpop.f32.mrf.mxu2  ;;  %v1634_v3 = vpop.f32.mrf.mxu0 }
 0x160   :  { %v1606_v63 = vpop.f32.mrf.mxu3 }
 0x161   :  { %v1607_v0 = vadd.f32 %v1606_v63, %v1594_v61 }
 0x163   :  { %v1620_v2 = vadd.f32 %v1619_v1, %v1607_v0 }
 0x164   :  { %v1645_v6 = vpop.f32.mrf.mxu1 }
 0x165   :  { %v1633_v4 = vadd.f32 %v1632_v60, %v1620_v2 }
 0x167   :  { %v1646_v8 = vadd.f32 %v1645_v6, %v1633_v4  ;;  %v1621_v10 = vpop.f32.mrf.mxu2 }
 0x168   :  { %v1608_v9 = vpop.f32.mrf.mxu3 }
 0x169   :  { %v1652_v11 = vmax.f32 %v1646_v8, 0.0 }
 0x16b   :  { %v1656_v12 = vpack.c.bf16 %v1652_v11, %v1652_v11 }
 0x16c   :  { %v1647_v5 = vpop.f32.mrf.mxu1 }
 0x16d   :  { %1964 = vmatmul.bf16.vlgmr.msrb.gmra.mxu0 %v1656_v12 }
 0x180   :  { %v1926_v13 = vpop.f32.mrf.mxu3 }
 0x181   :  { %v1927_v55 = vadd.f32 %v3142_v15, %v1926_v13 }
 0x188   :  { %v1928_v14 = vpop.f32.mrf.mxu3 }
 0x190   :  { %v1939_v17 = vpop.f32.mrf.mxu1 }
 0x191   :  { %v1940_v18 = vadd.f32 %v1939_v17, %v1927_v55 }
 0x198   :  { %v1941_v19 = vpop.f32.mrf.mxu1 }
 0x1cc   :  { %v1952_v20 = vpop.f32.mrf.mxu2 }
 0x1cd   :  { %v1953_v22 = vadd.f32 %v1952_v20, %v1940_v18 }
 0x1d4   :  { %v1954_v21 = vpop.f32.mrf.mxu2 }
 0x1ea   :  { %v1965_v23 = vpop.f32.mrf.mxu0 }
 0x1eb   :  { %v1966_v24 = vadd.f32 %v1965_v23, %v1953_v22 }
 0x1ed   :  { %1969 = vst [vmem:[#allocation10] sm:$0xff] %v1966_v24 }
 0x1ee   :  { %1980 = dma.vmem_to_hbm [thread:$0]  %s1976_s16, 128, %s1978_s19, [#allocation4]  }
 0x1f2   :  { %v1967_v7 = vpop.f32.mrf.mxu0 }
 0x1f3   :  { %3269 = dma.done.wait [#allocation4], 128  }
 0x1f4   :  { %3270 = vsyncadd [#allocation4], 4294967168 }
 0x1f5   :  { %1985 = vsyncpa [#allocation3], 1 }
 0x1f6   :  { %1986 = vsyncpa [#allocation6], 1 }
 0x1f7   :  { %1987 = vsyncpa [#allocation9], 1 }
 0x1f8   :  { %1988 = vsyncpa [#allocation4], 1 }

</bundles_post_ra>
